<compile_context>
chip_gen: v7x
topology: tpu7x:2x2x1
jax: 0.10.0
libtpu: 0.0.40
codegen_flags: <defaults>
</compile_context>

<pallas_src>
import functools
import math

import jax
import jax.numpy as jnp
from jax.experimental import pallas as pl
from jax.experimental.pallas import tpu as pltpu

LN_EPS = 1e-5  # torch.nn.LayerNorm default


def _layer_norm(x, g, b):
    mu = jnp.mean(x, axis=-1, keepdims=True)
    var = jnp.mean((x - mu) ** 2, axis=-1, keepdims=True)
    return (x - mu) * jax.lax.rsqrt(var + LN_EPS) * g + b


def _gelu(x):
    # Exact (erf) GELU, matching torch.nn.GELU default.
    # TODO(synk): tanh-approx GELU would move this off the VALU onto the EUP on
    # v6e/v7x if the accuracy contract allows.
    return 0.5 * x * (1.0 + jax.lax.erf(x * 0.7071067811865476))


def fused_transformer_kernel(
    x_ref,
    ln1_g_ref, ln1_b_ref, wq_ref, wk_ref, wv_ref, wo_ref, bo_ref,
    ln2_g_ref, ln2_b_ref, w1_ref, b1_ref, w2_ref, b2_ref,
    o_ref,
    *, heads, dim_head, mlp_chunk,
):
    layer = pl.program_id(1)

    # Layer 0: load the residual stream into the resident output accumulator.
    @pl.when(layer == 0)
    def _():
        o_ref[...] = x_ref[...]

    bt, n, d = o_ref.shape
    tokens = bt * n
    cdt = wq_ref.dtype          # MXU compute dtype (bf16 in prod), fp32 accum

    x = o_ref[...].reshape(tokens, d)          # (tokens, D), lane-dense

    # ---------------- Residual(PreNorm(Attention)) ----------------
    xn = _layer_norm(x, ln1_g_ref[0], ln1_b_ref[0]).astype(cdt)

    # One big lane-dense projection each (softmax scale pre-folded into Wq).
    q = jnp.dot(xn, wq_ref[0], preferred_element_type=jnp.float32)
    k = jnp.dot(xn, wk_ref[0], preferred_element_type=jnp.float32)
    v = jnp.dot(xn, wv_ref[0], preferred_element_type=jnp.float32)

    q3 = q.reshape(bt, n, -1).astype(cdt)      # (bt, n, inner)
    k3 = k.reshape(bt, n, -1).astype(cdt)
    v3 = v.reshape(bt, n, -1).astype(cdt)

    # Per-head attention.  Each head's context is contracted directly with its
    # row-slice of Wo and accumulated into a lane-dense (tokens, dim) fp32
    # accumulator — no (tokens, inner) reassembly, no masked lane stores.
    acc = x + bo_ref[0]
    for h in range(heads):
        lo, hi = h * dim_head, (h + 1) * dim_head
        qh = q3[:, :, lo:hi]
        kh = k3[:, :, lo:hi]
        vh = v3[:, :, lo:hi]
        dots = jnp.einsum("bnd,bmd->bnm", qh, kh,
                          preferred_element_type=jnp.float32)      # (bt, n, n)
        m = jnp.max(dots, axis=-1, keepdims=True)
        e = jnp.exp(dots - m)
        attn = e * pl.reciprocal(jnp.sum(e, axis=-1, keepdims=True), approx=True)
        ctx = jnp.einsum("bnm,bmd->bnd", attn.astype(cdt), vh,
                         preferred_element_type=jnp.float32)       # (bt, n, dh)
        acc = acc + jnp.dot(ctx.reshape(tokens, dim_head).astype(cdt),
                            wo_ref[0, lo:hi, :],
                            preferred_element_type=jnp.float32)
    x = acc

    # ---------------- Residual(PreNorm(FeedForward)) ----------------
    xn2 = _layer_norm(x, ln2_g_ref[0], ln2_b_ref[0]).astype(cdt)
    mlp_dim = w1_ref.shape[-1]
    step = min(mlp_chunk, mlp_dim)
    ffn = x + b2_ref[0]
    for c0 in range(0, mlp_dim, step):
        cs = min(step, mlp_dim - c0)
        hid = _gelu(jnp.dot(xn2, w1_ref[0, :, c0:c0 + cs],
                            preferred_element_type=jnp.float32)
                    + b1_ref[0, :, c0:c0 + cs])
        ffn = ffn + jnp.dot(hid.astype(cdt), w2_ref[0, c0:c0 + cs, :],
                            preferred_element_type=jnp.float32)
    x = ffn

    o_ref[...] = x.reshape(bt, n, d)


def run_transformer(x, p, *, heads, dim_head, scale, batch_tile=None,
                    mlp_chunk=512):
    """Runs the full depth in ONE pallas_call.  `p` holds depth-stacked params.

    For production shapes pad N to a multiple of 8 and keep D / inner / mlp_dim
    multiples of 128 wrapper-side.  On v7x pass batch_tile=B//2 so the batch
    axis (marked "parallel") shards across both TensorCores.
    """
    B, N, D = x.shape
    depth = p["wq"].shape[0]
    bt = B if batch_tile is None else batch_tile
    assert B % bt == 0

    # Fold the softmax scale into Wq (free, vs. scaling the (b,h,n,n) scores).
    wq = (p["wq"].astype(jnp.float32) * scale).astype(p["wq"].dtype)

    weight_names = ("ln1_g", "ln1_b", "wq", "wk", "wv", "wo", "bo",
                    "ln2_g", "ln2_b", "w1", "b1", "w2", "b2")
    weights = [wq if n_ == "wq" else p[n_] for n_ in weight_names]

    def wspec(arr):
        nd = arr.ndim
        return pl.BlockSpec((1,) + tuple(arr.shape[1:]),
                            lambda b, l, _nd=nd: (l,) + (0,) * (_nd - 1))

    # VMEM budget: double-buffered per-layer weight blocks + in/out activation
    # blocks + headroom for attention/FFN intermediates, capped below physical
    # VMEM (auto-shrinks on v7x's 64 MiB parts when get_tpu_info is available).
    per_layer_w = sum(math.prod(a.shape[1:]) * a.dtype.itemsize for a in weights)
    act_block = bt * N * D * 4
    needed = 2 * per_layer_w + 4 * act_block + (8 << 20)
    cap = 96 << 20
    try:
        cap = min(cap, int(pltpu.get_tpu_info().vmem_capacity_bytes * 0.85))
    except Exception:
        pass
    vmem_limit = int(min(max(needed, 32 << 20), cap))

    kernel = functools.partial(fused_transformer_kernel, heads=heads,
                               dim_head=dim_head, mlp_chunk=mlp_chunk)

    return pl.pallas_call(
        kernel,
        out_shape=jax.ShapeDtypeStruct((B, N, D), jnp.float32),
        grid=(B // bt, depth),
        in_specs=[pl.BlockSpec((bt, N, D), lambda b, l: (b, 0, 0))]
                 + [wspec(a) for a in weights],
        out_specs=pl.BlockSpec((bt, N, D), lambda b, l: (b, 0, 0)),
        compiler_params=pltpu.CompilerParams(
            dimension_semantics=("parallel", "arbitrary"),
            vmem_limit_bytes=vmem_limit,
        ),
    )(x, *weights)


# ----------------------------- reference (pure JAX) --------------------------
def reference_forward(x, p, *, heads, dim_head, scale):
    depth = p["wq"].shape[0]
    B, N, D = x.shape
    inner = heads * dim_head
    f32 = lambda a: a.astype(jnp.float32)

    def ln(y, g, b):
        mu = jnp.mean(y, -1, keepdims=True)
        var = jnp.mean((y - mu) ** 2, -1, keepdims=True)
        return (y - mu) * jax.lax.rsqrt(var + LN_EPS) * g + b

    for l in range(depth):
        xn = ln(x, f32(p["ln1_g"][l]), f32(p["ln1_b"][l]))
        q, k, v = xn @ f32(p["wq"][l]), xn @ f32(p["wk"][l]), xn @ f32(p["wv"][l])

        def split(t):  # 'b n (h d) -> b h n d'
            return t.reshape(B, N, heads, dim_head).transpose(0, 2, 1, 3)

        qh, kh, vh = split(q), split(k), split(v)
        dots = jnp.einsum("bhid,bhjd->bhij", qh, kh) * scale
        attn = jax.nn.softmax(dots, axis=-1)
        out = jnp.einsum("bhij,bhjd->bhid", attn, vh)
        out = out.transpose(0, 2, 1, 3).reshape(B, N, inner)
        x = x + (out @ f32(p["wo"][l]) + f32(p["bo"][l]))

        xn2 = ln(x, f32(p["ln2_g"][l]), f32(p["ln2_b"][l]))
        hid = jax.nn.gelu(xn2 @ f32(p["w1"][l]) + f32(p["b1"][l]), approximate=False)
        x = x + (hid @ f32(p["w2"][l]) + f32(p["b2"][l]))
    return x


# ----------------------------- param init ------------------------------------
def init_params(key, *, depth, dim, heads, dim_head, mlp_dim,
                weight_dtype=jnp.bfloat16):
    """Depth-stacked parameters.  Weights default to bfloat16 so every matmul
    (projections, attention einsums, FFN) runs on the MXU in bf16 with fp32
    accumulation; LN/bias params stay fp32."""
    inner = heads * dim_head
    k0, k1, k2, k3, k4, k5 = jax.random.split(key, 6)

    def rnd(k, shape, dtype):
        return (jax.random.normal(k, shape) * 0.02).astype(dtype)

    wqkv = rnd(k0, (depth, dim, 3 * inner), weight_dtype)
    return dict(
        ln1_g=jnp.ones((depth, 1, dim), jnp.float32),
        ln1_b=jnp.zeros((depth, 1, dim), jnp.float32),
        wq=wqkv[:, :, 0 * inner:1 * inner],
        wk=wqkv[:, :, 1 * inner:2 * inner],
        wv=wqkv[:, :, 2 * inner:3 * inner],
        wo=rnd(k1, (depth, inner, dim), weight_dtype),
        bo=rnd(k2, (depth, 1, dim), jnp.float32),
        ln2_g=jnp.ones((depth, 1, dim), jnp.float32),
        ln2_b=jnp.zeros((depth, 1, dim), jnp.float32),
        w1=rnd(k3, (depth, dim, mlp_dim), weight_dtype),
        b1=rnd(k4, (depth, 1, mlp_dim), jnp.float32),
        w2=rnd(k5, (depth, mlp_dim, dim), weight_dtype),
        b2=jnp.zeros((depth, 1, dim), jnp.float32),
    )


if __name__ == "__main__":
    # Small shapes consistent with Transformer(dim, depth, heads, dim_head, mlp_dim, dropout)
    B, N = 2, 8
    dim, depth, heads, dim_head, mlp_dim = 32, 2, 4, 8, 64

    key = jax.random.PRNGKey(0)
    kx, kp = jax.random.split(key)
    x = jax.random.normal(kx, (B, N, dim), dtype=jnp.float32)
    params = init_params(kp, depth=depth, dim=dim, heads=heads,
                         dim_head=dim_head, mlp_dim=mlp_dim)

    # Matches the PyTorch module: Attention.scale = dim ** -0.5 (NOT dim_head).
    scale = dim ** (-0.5)
    out = run_transformer(x, params, heads=heads, dim_head=dim_head, scale=scale)
    out = jax.block_until_ready(out)

    # Silent correctness check against a pure-JAX fp32 reference.
    # Tolerance accounts for bf16 MXU operands + the approximate EUP reciprocal.
    ref = reference_forward(x, params, heads=heads, dim_head=dim_head, scale=scale)
    assert out.shape == (B, N, dim)
    assert bool(jnp.allclose(out, ref, atol=2e-2, rtol=2e-2)), "mismatch vs reference"

    print("KERNEL_OK")
</pallas_src>

<mosaic_0001>
module attributes {stable_mosaic.version = 11 : i64} {
  func.func @fused_transformer_kernel(%arg0: i32, %arg1: i32, %arg2: memref<2x8x32xf32, #tpu.memory_space<vmem>>, %arg3: memref<1x1x32xf32, #tpu.memory_space<vmem>>, %arg4: memref<1x1x32xf32, #tpu.memory_space<vmem>>, %arg5: memref<1x32x32xbf16, #tpu.memory_space<vmem>>, %arg6: memref<1x32x32xbf16, #tpu.memory_space<vmem>>, %arg7: memref<1x32x32xbf16, #tpu.memory_space<vmem>>, %arg8: memref<1x32x32xbf16, #tpu.memory_space<vmem>>, %arg9: memref<1x1x32xf32, #tpu.memory_space<vmem>>, %arg10: memref<1x1x32xf32, #tpu.memory_space<vmem>>, %arg11: memref<1x1x32xf32, #tpu.memory_space<vmem>>, %arg12: memref<1x32x64xbf16, #tpu.memory_space<vmem>>, %arg13: memref<1x1x64xf32, #tpu.memory_space<vmem>>, %arg14: memref<1x64x32xbf16, #tpu.memory_space<vmem>>, %arg15: memref<1x1x32xf32, #tpu.memory_space<vmem>>, %arg16: memref<2x8x32xf32, #tpu.memory_space<vmem>>) attributes {dimension_semantics = [#tpu.dimension_semantics<parallel>, #tpu.dimension_semantics<arbitrary>], iteration_bounds = array<i64: 1, 2>, scalar_prefetch = 0 : i64, scratch_operands = 0 : i64, tpu.core_type = #tpu.core_type<tc>, window_params = [{transform_indices = @transform_0, window_bounds = array<i64: 2, 8, 32>}, {transform_indices = @transform_1, window_bounds = array<i64: 1, 1, 32>}, {transform_indices = @transform_2, window_bounds = array<i64: 1, 1, 32>}, {transform_indices = @transform_3, window_bounds = array<i64: 1, 32, 32>}, {transform_indices = @transform_4, window_bounds = array<i64: 1, 32, 32>}, {transform_indices = @transform_5, window_bounds = array<i64: 1, 32, 32>}, {transform_indices = @transform_6, window_bounds = array<i64: 1, 32, 32>}, {transform_indices = @transform_7, window_bounds = array<i64: 1, 1, 32>}, {transform_indices = @transform_8, window_bounds = array<i64: 1, 1, 32>}, {transform_indices = @transform_9, window_bounds = array<i64: 1, 1, 32>}, {transform_indices = @transform_10, window_bounds = array<i64: 1, 32, 64>}, {transform_indices = @transform_11, window_bounds = array<i64: 1, 1, 64>}, {transform_indices = @transform_12, window_bounds = array<i64: 1, 64, 32>}, {transform_indices = @transform_13, window_bounds = array<i64: 1, 1, 32>}, {transform_indices = @transform_14, window_bounds = array<i64: 2, 8, 32>}]} {
    %c0_i32 = arith.constant 0 : i32
    %0 = arith.cmpi eq, %arg1, %c0_i32 : i32
    %1 = arith.extui %0 : i1 to i32
    %c0_i32_0 = arith.constant 0 : i32
    %2 = arith.cmpi ne, %1, %c0_i32_0 : i32
    scf.if %2 {
      %c0_88 = arith.constant 0 : index
      %c0_89 = arith.constant 0 : index
      %c0_90 = arith.constant 0 : index
      %192 = vector.load %arg2[%c0_88, %c0_89, %c0_90] : memref<2x8x32xf32, #tpu.memory_space<vmem>>, vector<2x8x32xf32>
      %c0_91 = arith.constant 0 : index
      %c0_92 = arith.constant 0 : index
      %c0_93 = arith.constant 0 : index
      %193 = vector.load %arg16[%c0_91, %c0_92, %c0_93] : memref<2x8x32xf32, #tpu.memory_space<vmem>>, vector<2x8x32xf32>
      tpu.vector_store %arg16[%c0_91, %c0_92, %c0_93], %192 {strides = array<i32>} : memref<2x8x32xf32, #tpu.memory_space<vmem>>, vector<2x8x32xf32>,
    } else {
    }
    %c0 = arith.constant 0 : index
    %c0_1 = arith.constant 0 : index
    %c0_2 = arith.constant 0 : index
    %3 = vector.load %arg16[%c0, %c0_1, %c0_2] : memref<2x8x32xf32, #tpu.memory_space<vmem>>, vector<2x8x32xf32>
    %4 = vector.shape_cast %3 : vector<2x8x32xf32> to vector<16x32xf32>
    %c0_3 = arith.constant 0 : index
    %c0_4 = arith.constant 0 : index
    %c0_5 = arith.constant 0 : index
    %5 = vector.load %arg3[%c0_3, %c0_4, %c0_5] : memref<1x1x32xf32, #tpu.memory_space<vmem>>, vector<1x1x32xf32>
    %6 = vector.shape_cast %5 : vector<1x1x32xf32> to vector<1x32xf32>
    %c0_6 = arith.constant 0 : index
    %c0_7 = arith.constant 0 : index
    %c0_8 = arith.constant 0 : index
    %7 = vector.load %arg4[%c0_6, %c0_7, %c0_8] : memref<1x1x32xf32, #tpu.memory_space<vmem>>, vector<1x1x32xf32>
    %8 = vector.shape_cast %7 : vector<1x1x32xf32> to vector<1x32xf32>
    %cst = arith.constant dense<0.000000e+00> : vector<16xf32>
    %9 = vector.multi_reduction <add>, %4, %cst [1] : vector<16x32xf32> to vector<16xf32>
    %10 = vector.shape_cast %9 : vector<16xf32> to vector<16x1xf32>
    %cst_9 = arith.constant 3.200000e+01 : f32
    %11 = vector.broadcast %cst_9 : f32 to vector<16x1xf32>
    %12 = arith.divf %10, %11 : vector<16x1xf32>
    %13 = vector.broadcast %12 : vector<16x1xf32> to vector<16x32xf32>
    %14 = arith.subf %4, %13 : vector<16x32xf32>
    %15 = arith.mulf %14, %14 : vector<16x32xf32>
    %cst_10 = arith.constant dense<0.000000e+00> : vector<16xf32>
    %16 = vector.multi_reduction <add>, %15, %cst_10 [1] : vector<16x32xf32> to vector<16xf32>
    %17 = vector.shape_cast %16 : vector<16xf32> to vector<16x1xf32>
    %cst_11 = arith.constant 3.200000e+01 : f32
    %18 = vector.broadcast %cst_11 : f32 to vector<16x1xf32>
    %19 = arith.divf %17, %18 : vector<16x1xf32>
    %20 = vector.broadcast %12 : vector<16x1xf32> to vector<16x32xf32>
    %21 = arith.subf %4, %20 : vector<16x32xf32>
    %cst_12 = arith.constant 9.99999974E-6 : f32
    %22 = vector.broadcast %cst_12 : f32 to vector<16x1xf32>
    %23 = arith.addf %19, %22 : vector<16x1xf32>
    %24 = math.rsqrt %23 : vector<16x1xf32>
    %25 = vector.broadcast %24 : vector<16x1xf32> to vector<16x32xf32>
    %26 = arith.mulf %21, %25 : vector<16x32xf32>
    %27 = vector.broadcast %6 : vector<1x32xf32> to vector<16x32xf32>
    %28 = arith.mulf %26, %27 : vector<16x32xf32>
    %29 = vector.broadcast %8 : vector<1x32xf32> to vector<16x32xf32>
    %30 = arith.addf %28, %29 : vector<16x32xf32>
    %31 = arith.truncf %30 : vector<16x32xf32> to vector<16x32xbf16>
    %c0_13 = arith.constant 0 : index
    %c0_14 = arith.constant 0 : index
    %c0_15 = arith.constant 0 : index
    %32 = vector.load %arg5[%c0_13, %c0_14, %c0_15] : memref<1x32x32xbf16, #tpu.memory_space<vmem>>, vector<1x32x32xbf16>
    %33 = vector.shape_cast %32 : vector<1x32x32xbf16> to vector<32x32xbf16>
    %cst_16 = arith.constant dense<0.000000e+00> : vector<16x32xf32>
    %34 = tpu.matmul %31, %33, %cst_16 {dimension_numbers = #tpu.dot_dimension_numbers<[1], [0], [0], [1], [0, 0, 1, 1], [], []>} : vector<16x32xbf16>, vector<32x32xbf16>, vector<16x32xf32> -> vector<16x32xf32>
    %c0_17 = arith.constant 0 : index
    %c0_18 = arith.constant 0 : index
    %c0_19 = arith.constant 0 : index
    %35 = vector.load %arg6[%c0_17, %c0_18, %c0_19] : memref<1x32x32xbf16, #tpu.memory_space<vmem>>, vector<1x32x32xbf16>
    %36 = vector.shape_cast %35 : vector<1x32x32xbf16> to vector<32x32xbf16>
    %cst_20 = arith.constant dense<0.000000e+00> : vector<16x32xf32>
    %37 = tpu.matmul %31, %36, %cst_20 {dimension_numbers = #tpu.dot_dimension_numbers<[1], [0], [0], [1], [0, 0, 1, 1], [], []>} : vector<16x32xbf16>, vector<32x32xbf16>, vector<16x32xf32> -> vector<16x32xf32>
    %c0_21 = arith.constant 0 : index
    %c0_22 = arith.constant 0 : index
    %c0_23 = arith.constant 0 : index
    %38 = vector.load %arg7[%c0_21, %c0_22, %c0_23] : memref<1x32x32xbf16, #tpu.memory_space<vmem>>, vector<1x32x32xbf16>
    %39 = vector.shape_cast %38 : vector<1x32x32xbf16> to vector<32x32xbf16>
    %cst_24 = arith.constant dense<0.000000e+00> : vector<16x32xf32>
    %40 = tpu.matmul %31, %39, %cst_24 {dimension_numbers = #tpu.dot_dimension_numbers<[1], [0], [0], [1], [0, 0, 1, 1], [], []>} : vector<16x32xbf16>, vector<32x32xbf16>, vector<16x32xf32> -> vector<16x32xf32>
    %41 = vector.shape_cast %34 : vector<16x32xf32> to vector<2x8x32xf32>
    %42 = arith.truncf %41 : vector<2x8x32xf32> to vector<2x8x32xbf16>
    %43 = vector.shape_cast %37 : vector<16x32xf32> to vector<2x8x32xf32>
    %44 = arith.truncf %43 : vector<2x8x32xf32> to vector<2x8x32xbf16>
    %45 = vector.shape_cast %40 : vector<16x32xf32> to vector<2x8x32xf32>
    %46 = arith.truncf %45 : vector<2x8x32xf32> to vector<2x8x32xbf16>
    %c0_25 = arith.constant 0 : index
    %c0_26 = arith.constant 0 : index
    %c0_27 = arith.constant 0 : index
    %47 = vector.load %arg9[%c0_25, %c0_26, %c0_27] : memref<1x1x32xf32, #tpu.memory_space<vmem>>, vector<1x1x32xf32>
    %48 = vector.shape_cast %47 : vector<1x1x32xf32> to vector<1x32xf32>
    %49 = vector.broadcast %48 : vector<1x32xf32> to vector<16x32xf32>
    %50 = arith.addf %4, %49 : vector<16x32xf32>
    %51 = vector.extract_strided_slice %42 {offsets = [0, 0, 0], sizes = [2, 8, 8], strides = [1, 1, 1]} : vector<2x8x32xbf16> to vector<2x8x8xbf16>
    %52 = vector.extract_strided_slice %44 {offsets = [0, 0, 0], sizes = [2, 8, 8], strides = [1, 1, 1]} : vector<2x8x32xbf16> to vector<2x8x8xbf16>
    %53 = vector.extract_strided_slice %46 {offsets = [0, 0, 0], sizes = [2, 8, 8], strides = [1, 1, 1]} : vector<2x8x32xbf16> to vector<2x8x8xbf16>
    "tpu.trace_start"() <{level = 10 : i32, message = "bnd,bmd->bnm"}> : () -> ()
    %cst_28 = arith.constant dense<0.000000e+00> : vector<2x8x8xf32>
    %54 = tpu.matmul %51, %52, %cst_28 {dimension_numbers = #tpu.dot_dimension_numbers<[2], [2], [1], [1], [0, 0, 0, 1, 1, 1], [0], [0]>} : vector<2x8x8xbf16>, vector<2x8x8xbf16>, vector<2x8x8xf32> -> vector<2x8x8xf32>
    "tpu.trace_stop"() : () -> ()
    %cst_29 = arith.constant dense<0xFF800000> : vector<2x8xf32>
    %55 = vector.multi_reduction <maximumf>, %54, %cst_29 [2] : vector<2x8x8xf32> to vector<2x8xf32>
    %56 = vector.shape_cast %55 : vector<2x8xf32> to vector<2x8x1xf32>
    %57 = vector.broadcast %56 : vector<2x8x1xf32> to vector<2x8x8xf32>
    %58 = arith.subf %54, %57 : vector<2x8x8xf32>
    %59 = math.exp %58 : vector<2x8x8xf32>
    %cst_30 = arith.constant dense<0.000000e+00> : vector<2x8xf32>
    %60 = vector.multi_reduction <add>, %59, %cst_30 [2] : vector<2x8x8xf32> to vector<2x8xf32>
    %61 = vector.shape_cast %60 : vector<2x8xf32> to vector<2x8x1xf32>
    %62 = tpu.reciprocal %61 {approx = true} : vector<2x8x1xf32> -> vector<2x8x1xf32>
    %63 = vector.broadcast %62 : vector<2x8x1xf32> to vector<2x8x8xf32>
    %64 = arith.mulf %59, %63 : vector<2x8x8xf32>
    %65 = arith.truncf %64 : vector<2x8x8xf32> to vector<2x8x8xbf16>
    "tpu.trace_start"() <{level = 10 : i32, message = "bnm,bmd->bnd"}> : () -> ()
    %cst_31 = arith.constant dense<0.000000e+00> : vector<2x8x8xf32>
    %66 = tpu.matmul %65, %53, %cst_31 {dimension_numbers = #tpu.dot_dimension_numbers<[2], [1], [1], [2], [0, 0, 0, 1, 1, 2], [0], [0]>} : vector<2x8x8xbf16>, vector<2x8x8xbf16>, vector<2x8x8xf32> -> vector<2x8x8xf32>
    "tpu.trace_stop"() : () -> ()
    %67 = vector.shape_cast %66 : vector<2x8x8xf32> to vector<16x8xf32>
    %68 = arith.truncf %67 : vector<16x8xf32> to vector<16x8xbf16>
    %c0_32 = arith.constant 0 : index
    %c0_33 = arith.constant 0 : index
    %c0_34 = arith.constant 0 : index
    %69 = vector.load %arg8[%c0_32, %c0_33, %c0_34] : memref<1x32x32xbf16, #tpu.memory_space<vmem>>, vector<1x8x32xbf16>
    %70 = vector.shape_cast %69 : vector<1x8x32xbf16> to vector<8x32xbf16>
    %cst_35 = arith.constant dense<0.000000e+00> : vector<16x32xf32>
    %71 = tpu.matmul %68, %70, %cst_35 {dimension_numbers = #tpu.dot_dimension_numbers<[1], [0], [0], [1], [0, 0, 1, 1], [], []>} : vector<16x8xbf16>, vector<8x32xbf16>, vector<16x32xf32> -> vector<16x32xf32>
    %72 = arith.addf %50, %71 : vector<16x32xf32>
    %73 = vector.extract_strided_slice %42 {offsets = [0, 0, 8], sizes = [2, 8, 8], strides = [1, 1, 1]} : vector<2x8x32xbf16> to vector<2x8x8xbf16>
    %74 = vector.extract_strided_slice %44 {offsets = [0, 0, 8], sizes = [2, 8, 8], strides = [1, 1, 1]} : vector<2x8x32xbf16> to vector<2x8x8xbf16>
    %75 = vector.extract_strided_slice %46 {offsets = [0, 0, 8], sizes = [2, 8, 8], strides = [1, 1, 1]} : vector<2x8x32xbf16> to vector<2x8x8xbf16>
    "tpu.trace_start"() <{level = 10 : i32, message = "bnd,bmd->bnm"}> : () -> ()
    %cst_36 = arith.constant dense<0.000000e+00> : vector<2x8x8xf32>
    %76 = tpu.matmul %73, %74, %cst_36 {dimension_numbers = #tpu.dot_dimension_numbers<[2], [2], [1], [1], [0, 0, 0, 1, 1, 1], [0], [0]>} : vector<2x8x8xbf16>, vector<2x8x8xbf16>, vector<2x8x8xf32> -> vector<2x8x8xf32>
    "tpu.trace_stop"() : () -> ()
    %cst_37 = arith.constant dense<0xFF800000> : vector<2x8xf32>
    %77 = vector.multi_reduction <maximumf>, %76, %cst_37 [2] : vector<2x8x8xf32> to vector<2x8xf32>
    %78 = vector.shape_cast %77 : vector<2x8xf32> to vector<2x8x1xf32>
    %79 = vector.broadcast %78 : vector<2x8x1xf32> to vector<2x8x8xf32>
    %80 = arith.subf %76, %79 : vector<2x8x8xf32>
    %81 = math.exp %80 : vector<2x8x8xf32>
    %cst_38 = arith.constant dense<0.000000e+00> : vector<2x8xf32>
    %82 = vector.multi_reduction <add>, %81, %cst_38 [2] : vector<2x8x8xf32> to vector<2x8xf32>
    %83 = vector.shape_cast %82 : vector<2x8xf32> to vector<2x8x1xf32>
    %84 = tpu.reciprocal %83 {approx = true} : vector<2x8x1xf32> -> vector<2x8x1xf32>
    %85 = vector.broadcast %84 : vector<2x8x1xf32> to vector<2x8x8xf32>
    %86 = arith.mulf %81, %85 : vector<2x8x8xf32>
    %87 = arith.truncf %86 : vector<2x8x8xf32> to vector<2x8x8xbf16>
    "tpu.trace_start"() <{level = 10 : i32, message = "bnm,bmd->bnd"}> : () -> ()
    %cst_39 = arith.constant dense<0.000000e+00> : vector<2x8x8xf32>
    %88 = tpu.matmul %87, %75, %cst_39 {dimension_numbers = #tpu.dot_dimension_numbers<[2], [1], [1], [2], [0, 0, 0, 1, 1, 2], [0], [0]>} : vector<2x8x8xbf16>, vector<2x8x8xbf16>, vector<2x8x8xf32> -> vector<2x8x8xf32>
    "tpu.trace_stop"() : () -> ()
    %89 = vector.shape_cast %88 : vector<2x8x8xf32> to vector<16x8xf32>
    %90 = arith.truncf %89 : vector<16x8xf32> to vector<16x8xbf16>
    %c0_40 = arith.constant 0 : index
    %c8 = arith.constant 8 : index
    %c0_41 = arith.constant 0 : index
    %91 = vector.load %arg8[%c0_40, %c8, %c0_41] : memref<1x32x32xbf16, #tpu.memory_space<vmem>>, vector<1x8x32xbf16>
    %92 = vector.shape_cast %91 : vector<1x8x32xbf16> to vector<8x32xbf16>
    %cst_42 = arith.constant dense<0.000000e+00> : vector<16x32xf32>
    %93 = tpu.matmul %90, %92, %cst_42 {dimension_numbers = #tpu.dot_dimension_numbers<[1], [0], [0], [1], [0, 0, 1, 1], [], []>} : vector<16x8xbf16>, vector<8x32xbf16>, vector<16x32xf32> -> vector<16x32xf32>
    %94 = arith.addf %72, %93 : vector<16x32xf32>
    %95 = vector.extract_strided_slice %42 {offsets = [0, 0, 16], sizes = [2, 8, 8], strides = [1, 1, 1]} : vector<2x8x32xbf16> to vector<2x8x8xbf16>
    %96 = vector.extract_strided_slice %44 {offsets = [0, 0, 16], sizes = [2, 8, 8], strides = [1, 1, 1]} : vector<2x8x32xbf16> to vector<2x8x8xbf16>
    %97 = vector.extract_strided_slice %46 {offsets = [0, 0, 16], sizes = [2, 8, 8], strides = [1, 1, 1]} : vector<2x8x32xbf16> to vector<2x8x8xbf16>
    "tpu.trace_start"() <{level = 10 : i32, message = "bnd,bmd->bnm"}> : () -> ()
    %cst_43 = arith.constant dense<0.000000e+00> : vector<2x8x8xf32>
    %98 = tpu.matmul %95, %96, %cst_43 {dimension_numbers = #tpu.dot_dimension_numbers<[2], [2], [1], [1], [0, 0, 0, 1, 1, 1], [0], [0]>} : vector<2x8x8xbf16>, vector<2x8x8xbf16>, vector<2x8x8xf32> -> vector<2x8x8xf32>
    "tpu.trace_stop"() : () -> ()
    %cst_44 = arith.constant dense<0xFF800000> : vector<2x8xf32>
    %99 = vector.multi_reduction <maximumf>, %98, %cst_44 [2] : vector<2x8x8xf32> to vector<2x8xf32>
    %100 = vector.shape_cast %99 : vector<2x8xf32> to vector<2x8x1xf32>
    %101 = vector.broadcast %100 : vector<2x8x1xf32> to vector<2x8x8xf32>
    %102 = arith.subf %98, %101 : vector<2x8x8xf32>
    %103 = math.exp %102 : vector<2x8x8xf32>
    %cst_45 = arith.constant dense<0.000000e+00> : vector<2x8xf32>
    %104 = vector.multi_reduction <add>, %103, %cst_45 [2] : vector<2x8x8xf32> to vector<2x8xf32>
    %105 = vector.shape_cast %104 : vector<2x8xf32> to vector<2x8x1xf32>
    %106 = tpu.reciprocal %105 {approx = true} : vector<2x8x1xf32> -> vector<2x8x1xf32>
    %107 = vector.broadcast %106 : vector<2x8x1xf32> to vector<2x8x8xf32>
    %108 = arith.mulf %103, %107 : vector<2x8x8xf32>
    %109 = arith.truncf %108 : vector<2x8x8xf32> to vector<2x8x8xbf16>
    "tpu.trace_start"() <{level = 10 : i32, message = "bnm,bmd->bnd"}> : () -> ()
    %cst_46 = arith.constant dense<0.000000e+00> : vector<2x8x8xf32>
    %110 = tpu.matmul %109, %97, %cst_46 {dimension_numbers = #tpu.dot_dimension_numbers<[2], [1], [1], [2], [0, 0, 0, 1, 1, 2], [0], [0]>} : vector<2x8x8xbf16>, vector<2x8x8xbf16>, vector<2x8x8xf32> -> vector<2x8x8xf32>
    "tpu.trace_stop"() : () -> ()
    %111 = vector.shape_cast %110 : vector<2x8x8xf32> to vector<16x8xf32>
    %112 = arith.truncf %111 : vector<16x8xf32> to vector<16x8xbf16>
    %c0_47 = arith.constant 0 : index
    %c16 = arith.constant 16 : index
    %c0_48 = arith.constant 0 : index
    %113 = vector.load %arg8[%c0_47, %c16, %c0_48] : memref<1x32x32xbf16, #tpu.memory_space<vmem>>, vector<1x8x32xbf16>
    %114 = vector.shape_cast %113 : vector<1x8x32xbf16> to vector<8x32xbf16>
    %cst_49 = arith.constant dense<0.000000e+00> : vector<16x32xf32>
    %115 = tpu.matmul %112, %114, %cst_49 {dimension_numbers = #tpu.dot_dimension_numbers<[1], [0], [0], [1], [0, 0, 1, 1], [], []>} : vector<16x8xbf16>, vector<8x32xbf16>, vector<16x32xf32> -> vector<16x32xf32>
    %116 = arith.addf %94, %115 : vector<16x32xf32>
    %117 = vector.extract_strided_slice %42 {offsets = [0, 0, 24], sizes = [2, 8, 8], strides = [1, 1, 1]} : vector<2x8x32xbf16> to vector<2x8x8xbf16>
    %118 = vector.extract_strided_slice %44 {offsets = [0, 0, 24], sizes = [2, 8, 8], strides = [1, 1, 1]} : vector<2x8x32xbf16> to vector<2x8x8xbf16>
    %119 = vector.extract_strided_slice %46 {offsets = [0, 0, 24], sizes = [2, 8, 8], strides = [1, 1, 1]} : vector<2x8x32xbf16> to vector<2x8x8xbf16>
    "tpu.trace_start"() <{level = 10 : i32, message = "bnd,bmd->bnm"}> : () -> ()
    %cst_50 = arith.constant dense<0.000000e+00> : vector<2x8x8xf32>
    %120 = tpu.matmul %117, %118, %cst_50 {dimension_numbers = #tpu.dot_dimension_numbers<[2], [2], [1], [1], [0, 0, 0, 1, 1, 1], [0], [0]>} : vector<2x8x8xbf16>, vector<2x8x8xbf16>, vector<2x8x8xf32> -> vector<2x8x8xf32>
    "tpu.trace_stop"() : () -> ()
    %cst_51 = arith.constant dense<0xFF800000> : vector<2x8xf32>
    %121 = vector.multi_reduction <maximumf>, %120, %cst_51 [2] : vector<2x8x8xf32> to vector<2x8xf32>
    %122 = vector.shape_cast %121 : vector<2x8xf32> to vector<2x8x1xf32>
    %123 = vector.broadcast %122 : vector<2x8x1xf32> to vector<2x8x8xf32>
    %124 = arith.subf %120, %123 : vector<2x8x8xf32>
    %125 = math.exp %124 : vector<2x8x8xf32>
    %cst_52 = arith.constant dense<0.000000e+00> : vector<2x8xf32>
    %126 = vector.multi_reduction <add>, %125, %cst_52 [2] : vector<2x8x8xf32> to vector<2x8xf32>
    %127 = vector.shape_cast %126 : vector<2x8xf32> to vector<2x8x1xf32>
    %128 = tpu.reciprocal %127 {approx = true} : vector<2x8x1xf32> -> vector<2x8x1xf32>
    %129 = vector.broadcast %128 : vector<2x8x1xf32> to vector<2x8x8xf32>
    %130 = arith.mulf %125, %129 : vector<2x8x8xf32>
    %131 = arith.truncf %130 : vector<2x8x8xf32> to vector<2x8x8xbf16>
    "tpu.trace_start"() <{level = 10 : i32, message = "bnm,bmd->bnd"}> : () -> ()
    %cst_53 = arith.constant dense<0.000000e+00> : vector<2x8x8xf32>
    %132 = tpu.matmul %131, %119, %cst_53 {dimension_numbers = #tpu.dot_dimension_numbers<[2], [1], [1], [2], [0, 0, 0, 1, 1, 2], [0], [0]>} : vector<2x8x8xbf16>, vector<2x8x8xbf16>, vector<2x8x8xf32> -> vector<2x8x8xf32>
    "tpu.trace_stop"() : () -> ()
    %133 = vector.shape_cast %132 : vector<2x8x8xf32> to vector<16x8xf32>
    %134 = arith.truncf %133 : vector<16x8xf32> to vector<16x8xbf16>
    %c0_54 = arith.constant 0 : index
    %c24 = arith.constant 24 : index
    %c0_55 = arith.constant 0 : index
    %135 = vector.load %arg8[%c0_54, %c24, %c0_55] : memref<1x32x32xbf16, #tpu.memory_space<vmem>>, vector<1x8x32xbf16>
    %136 = vector.shape_cast %135 : vector<1x8x32xbf16> to vector<8x32xbf16>
    %cst_56 = arith.constant dense<0.000000e+00> : vector<16x32xf32>
    %137 = tpu.matmul %134, %136, %cst_56 {dimension_numbers = #tpu.dot_dimension_numbers<[1], [0], [0], [1], [0, 0, 1, 1], [], []>} : vector<16x8xbf16>, vector<8x32xbf16>, vector<16x32xf32> -> vector<16x32xf32>
    %138 = arith.addf %116, %137 : vector<16x32xf32>
    %c0_57 = arith.constant 0 : index
    %c0_58 = arith.constant 0 : index
    %c0_59 = arith.constant 0 : index
    %139 = vector.load %arg10[%c0_57, %c0_58, %c0_59] : memref<1x1x32xf32, #tpu.memory_space<vmem>>, vector<1x1x32xf32>
    %140 = vector.shape_cast %139 : vector<1x1x32xf32> to vector<1x32xf32>
    %c0_60 = arith.constant 0 : index
    %c0_61 = arith.constant 0 : index
    %c0_62 = arith.constant 0 : index
    %141 = vector.load %arg11[%c0_60, %c0_61, %c0_62] : memref<1x1x32xf32, #tpu.memory_space<vmem>>, vector<1x1x32xf32>
    %142 = vector.shape_cast %141 : vector<1x1x32xf32> to vector<1x32xf32>
    %cst_63 = arith.constant dense<0.000000e+00> : vector<16xf32>
    %143 = vector.multi_reduction <add>, %138, %cst_63 [1] : vector<16x32xf32> to vector<16xf32>
    %144 = vector.shape_cast %143 : vector<16xf32> to vector<16x1xf32>
    %cst_64 = arith.constant 3.200000e+01 : f32
    %145 = vector.broadcast %cst_64 : f32 to vector<16x1xf32>
    %146 = arith.divf %144, %145 : vector<16x1xf32>
    %147 = vector.broadcast %146 : vector<16x1xf32> to vector<16x32xf32>
    %148 = arith.subf %138, %147 : vector<16x32xf32>
    %149 = arith.mulf %148, %148 : vector<16x32xf32>
    %cst_65 = arith.constant dense<0.000000e+00> : vector<16xf32>
    %150 = vector.multi_reduction <add>, %149, %cst_65 [1] : vector<16x32xf32> to vector<16xf32>
    %151 = vector.shape_cast %150 : vector<16xf32> to vector<16x1xf32>
    %cst_66 = arith.constant 3.200000e+01 : f32
    %152 = vector.broadcast %cst_66 : f32 to vector<16x1xf32>
    %153 = arith.divf %151, %152 : vector<16x1xf32>
    %154 = vector.broadcast %146 : vector<16x1xf32> to vector<16x32xf32>
    %155 = arith.subf %138, %154 : vector<16x32xf32>
    %cst_67 = arith.constant 9.99999974E-6 : f32
    %156 = vector.broadcast %cst_67 : f32 to vector<16x1xf32>
    %157 = arith.addf %153, %156 : vector<16x1xf32>
    %158 = math.rsqrt %157 : vector<16x1xf32>
    %159 = vector.broadcast %158 : vector<16x1xf32> to vector<16x32xf32>
    %160 = arith.mulf %155, %159 : vector<16x32xf32>
    %161 = vector.broadcast %140 : vector<1x32xf32> to vector<16x32xf32>
    %162 = arith.mulf %160, %161 : vector<16x32xf32>
    %163 = vector.broadcast %142 : vector<1x32xf32> to vector<16x32xf32>
    %164 = arith.addf %162, %163 : vector<16x32xf32>
    %165 = arith.truncf %164 : vector<16x32xf32> to vector<16x32xbf16>
    %c0_68 = arith.constant 0 : index
    %c0_69 = arith.constant 0 : index
    %c0_70 = arith.constant 0 : index
    %166 = vector.load %arg15[%c0_68, %c0_69, %c0_70] : memref<1x1x32xf32, #tpu.memory_space<vmem>>, vector<1x1x32xf32>
    %167 = vector.shape_cast %166 : vector<1x1x32xf32> to vector<1x32xf32>
    %168 = vector.broadcast %167 : vector<1x32xf32> to vector<16x32xf32>
    %169 = arith.addf %138, %168 : vector<16x32xf32>
    %c0_71 = arith.constant 0 : index
    %c0_72 = arith.constant 0 : index
    %c0_73 = arith.constant 0 : index
    %170 = vector.load %arg12[%c0_71, %c0_72, %c0_73] : memref<1x32x64xbf16, #tpu.memory_space<vmem>>, vector<1x32x64xbf16>
    %171 = vector.shape_cast %170 : vector<1x32x64xbf16> to vector<32x64xbf16>
    %cst_74 = arith.constant dense<0.000000e+00> : vector<16x64xf32>
    %172 = tpu.matmul %165, %171, %cst_74 {dimension_numbers = #tpu.dot_dimension_numbers<[1], [0], [0], [1], [0, 0, 1, 1], [], []>} : vector<16x32xbf16>, vector<32x64xbf16>, vector<16x64xf32> -> vector<16x64xf32>
    %c0_75 = arith.constant 0 : index
    %c0_76 = arith.constant 0 : index
    %c0_77 = arith.constant 0 : index
    %173 = vector.load %arg13[%c0_75, %c0_76, %c0_77] : memref<1x1x64xf32, #tpu.memory_space<vmem>>, vector<1x1x64xf32>
    %174 = vector.shape_cast %173 : vector<1x1x64xf32> to vector<1x64xf32>
    %175 = vector.broadcast %174 : vector<1x64xf32> to vector<16x64xf32>
    %176 = arith.addf %172, %175 : vector<16x64xf32>
    %cst_78 = arith.constant 5.000000e-01 : f32
    %177 = vector.broadcast %cst_78 : f32 to vector<16x64xf32>
    %178 = arith.mulf %177, %176 : vector<16x64xf32>
    %cst_79 = arith.constant 0.707106769 : f32
    %179 = vector.broadcast %cst_79 : f32 to vector<16x64xf32>
    %180 = arith.mulf %176, %179 : vector<16x64xf32>
    %181 = math.erf %180 : vector<16x64xf32>
    %cst_80 = arith.constant 1.000000e+00 : f32
    %182 = vector.broadcast %cst_80 : f32 to vector<16x64xf32>
    %183 = arith.addf %182, %181 : vector<16x64xf32>
    %184 = arith.mulf %178, %183 : vector<16x64xf32>
    %185 = arith.truncf %184 : vector<16x64xf32> to vector<16x64xbf16>
    %c0_81 = arith.constant 0 : index
    %c0_82 = arith.constant 0 : index
    %c0_83 = arith.constant 0 : index
    %186 = vector.load %arg14[%c0_81, %c0_82, %c0_83] : memref<1x64x32xbf16, #tpu.memory_space<vmem>>, vector<1x64x32xbf16>
    %187 = vector.shape_cast %186 : vector<1x64x32xbf16> to vector<64x32xbf16>
    %cst_84 = arith.constant dense<0.000000e+00> : vector<16x32xf32>
    %188 = tpu.matmul %185, %187, %cst_84 {dimension_numbers = #tpu.dot_dimension_numbers<[1], [0], [0], [1], [0, 0, 1, 1], [], []>} : vector<16x64xbf16>, vector<64x32xbf16>, vector<16x32xf32> -> vector<16x32xf32>
    %189 = arith.addf %169, %188 : vector<16x32xf32>
    %190 = vector.shape_cast %189 : vector<16x32xf32> to vector<2x8x32xf32>
    %c0_85 = arith.constant 0 : index
    %c0_86 = arith.constant 0 : index
    %c0_87 = arith.constant 0 : index
    %191 = vector.load %arg16[%c0_85, %c0_86, %c0_87] : memref<2x8x32xf32, #tpu.memory_space<vmem>>, vector<2x8x32xf32>
    tpu.vector_store %arg16[%c0_85, %c0_86, %c0_87], %190 {strides = array<i32>} : memref<2x8x32xf32, #tpu.memory_space<vmem>>, vector<2x8x32xf32>,
    return
  }
  func.func @transform_0(%arg0: i32, %arg1: i32) -> (i32, i32, i32) {
    %c0_i32 = arith.constant 0 : i32
    %c0_i32_0 = arith.constant 0 : i32
    %c0_i32_1 = arith.constant 0 : i32
    return %arg0, %c0_i32, %c0_i32_0 : i32, i32, i32
  }
  func.func @transform_1(%arg0: i32, %arg1: i32) -> (i32, i32, i32) {
    %c0_i32 = arith.constant 0 : i32
    %c0_i32_0 = arith.constant 0 : i32
    %c0_i32_1 = arith.constant 0 : i32
    return %arg1, %c0_i32, %c0_i32_0 : i32, i32, i32
  }
  func.func @transform_2(%arg0: i32, %arg1: i32) -> (i32, i32, i32) {
    %c0_i32 = arith.constant 0 : i32
    %c0_i32_0 = arith.constant 0 : i32
    %c0_i32_1 = arith.constant 0 : i32
    return %arg1, %c0_i32, %c0_i32_0 : i32, i32, i32
  }
  func.func @transform_3(%arg0: i32, %arg1: i32) -> (i32, i32, i32) {
    %c0_i32 = arith.constant 0 : i32
    %c0_i32_0 = arith.constant 0 : i32
    %c0_i32_1 = arith.constant 0 : i32
    return %arg1, %c0_i32, %c0_i32_0 : i32, i32, i32
  }
  func.func @transform_4(%arg0: i32, %arg1: i32) -> (i32, i32, i32) {
    %c0_i32 = arith.constant 0 : i32
    %c0_i32_0 = arith.constant 0 : i32
    %c0_i32_1 = arith.constant 0 : i32
    return %arg1, %c0_i32, %c0_i32_0 : i32, i32, i32
  }
  func.func @transform_5(%arg0: i32, %arg1: i32) -> (i32, i32, i32) {
    %c0_i32 = arith.constant 0 : i32
    %c0_i32_0 = arith.constant 0 : i32
    %c0_i32_1 = arith.constant 0 : i32
    return %arg1, %c0_i32, %c0_i32_0 : i32, i32, i32
  }
  func.func @transform_6(%arg0: i32, %arg1: i32) -> (i32, i32, i32) {
    %c0_i32 = arith.constant 0 : i32
    %c0_i32_0 = arith.constant 0 : i32
    %c0_i32_1 = arith.constant 0 : i32
    return %arg1, %c0_i32, %c0_i32_0 : i32, i32, i32
  }
  func.func @transform_7(%arg0: i32, %arg1: i32) -> (i32, i32, i32) {
    %c0_i32 = arith.constant 0 : i32
    %c0_i32_0 = arith.constant 0 : i32
    %c0_i32_1 = arith.constant 0 : i32
    return %arg1, %c0_i32, %c0_i32_0 : i32, i32, i32
  }
  func.func @transform_8(%arg0: i32, %arg1: i32) -> (i32, i32, i32) {
    %c0_i32 = arith.constant 0 : i32
    %c0_i32_0 = arith.constant 0 : i32
    %c0_i32_1 = arith.constant 0 : i32
    return %arg1, %c0_i32, %c0_i32_0 : i32, i32, i32
  }
  func.func @transform_9(%arg0: i32, %arg1: i32) -> (i32, i32, i32) {
    %c0_i32 = arith.constant 0 : i32
    %c0_i32_0 = arith.constant 0 : i32
    %c0_i32_1 = arith.constant 0 : i32
    return %arg1, %c0_i32, %c0_i32_0 : i32, i32, i32
  }
  func.func @transform_10(%arg0: i32, %arg1: i32) -> (i32, i32, i32) {
    %c0_i32 = arith.constant 0 : i32
    %c0_i32_0 = arith.constant 0 : i32
    %c0_i32_1 = arith.constant 0 : i32
    return %arg1, %c0_i32, %c0_i32_0 : i32, i32, i32
  }
  func.func @transform_11(%arg0: i32, %arg1: i32) -> (i32, i32, i32) {
    %c0_i32 = arith.constant 0 : i32
    %c0_i32_0 = arith.constant 0 : i32
    %c0_i32_1 = arith.constant 0 : i32
    return %arg1, %c0_i32, %c0_i32_0 : i32, i32, i32
  }
  func.func @transform_12(%arg0: i32, %arg1: i32) -> (i32, i32, i32) {
    %c0_i32 = arith.constant 0 : i32
    %c0_i32_0 = arith.constant 0 : i32
    %c0_i32_1 = arith.constant 0 : i32
    return %arg1, %c0_i32, %c0_i32_0 : i32, i32, i32
  }
  func.func @transform_13(%arg0: i32, %arg1: i32) -> (i32, i32, i32) {
    %c0_i32 = arith.constant 0 : i32
    %c0_i32_0 = arith.constant 0 : i32
    %c0_i32_1 = arith.constant 0 : i32
    return %arg1, %c0_i32, %c0_i32_0 : i32, i32, i32
  }
  func.func @transform_14(%arg0: i32, %arg1: i32) -> (i32, i32, i32) {
    %c0_i32 = arith.constant 0 : i32
    %c0_i32_0 = arith.constant 0 : i32
    %c0_i32_1 = arith.constant 0 : i32
    return %arg0, %c0_i32, %c0_i32_0 : i32, i32, i32
  }
}

</mosaic_0001>

<bundles_post_ra>
// kernel: tpu_custom_call.1
= control target key start
LH: loop header
LB: loop body
LE: loop exit
PB: predicated region body
PF: predicated region fallthrough
CT: control target
= control target key end

     0   :  { %s3783_s0 = inlined_call_operand.hbm [shape: f32[2,8,32], index: 0, kind: input, shape index: {}]   ;;  %s3784_s1 = inlined_call_operand.vmem [shape: f32[2,1,32], index: 1, kind: input, shape index: {}]   ;;  %s3785_s2 = inlined_call_operand.vmem [shape: f32[2,1,32], index: 2, kind: input, shape index: {}]   ;;  %s3786_s3 = inlined_call_operand.vmem [shape: bf16[2,32,32], index: 3, kind: input, shape index: {}]   ;;  %s3787_s4 = inlined_call_operand.vmem [shape: bf16[2,32,32], index: 4, kind: input, shape index: {}]   ;;  %s3788_s5 = inlined_call_operand.vmem [shape: bf16[2,32,32], index: 5, kind: input, shape index: {}]   ;;  %s3789_s6 = inlined_call_operand.hbm [shape: bf16[2,32,32], index: 6, kind: input, shape index: {}]   ;;  %s3790_s7 = inlined_call_operand.vmem [shape: f32[2,1,32], index: 7, kind: input, shape index: {}]   ;;  %s3791_s8 = inlined_call_operand.vmem [shape: f32[2,1,32], index: 8, kind: input, shape index: {}]   ;;  %s3792_s9 = inlined_call_operand.vmem [shape: f32[2,1,32], index: 9, kind: input, shape index: {}]   ;;  %s3793_s10 = inlined_call_operand.hbm [shape: bf16[2,32,64], index: 10, kind: input, shape index: {}]   ;;  %s3794_s11 = inlined_call_operand.vmem [shape: f32[2,1,64], index: 11, kind: input, shape index: {}]   ;;  %s3795_s12 = inlined_call_operand.vmem [shape: bf16[2,64,32], index: 12, kind: input, shape index: {}]   ;;  %s3796_s13 = inlined_call_operand.vmem [shape: f32[2,1,32], index: 13, kind: input, shape index: {}]   ;;  %s3797_s14 = inlined_call_operand.hbm [shape: f32[2,8,32], index: 14, kind: output, shape index: {}]  }
   0x1   :  { %3812 = sst [smem:[#allocation19_spill]] %s3783_s0 }
   0x2   :  { %3813 = sst [smem:[#allocation20_spill]] %s3786_s3 }
   0x3   :  { %3814 = sst [smem:[#allocation21_spill]] %s3787_s4 }
   0x4   :  { %3815 = sst [smem:[#allocation22_spill]] %s3788_s5 }
   0x5   :  { %3816 = sst [smem:[#allocation23_spill]] %s3789_s6 }
   0x6   :  { %3817 = sst [smem:[#allocation24_spill]] %s3793_s10 }
   0x7   :  { %3818 = sst [smem:[#allocation25_spill]] %s3795_s12 }
   0x8   :  { %3819 = sst [smem:[#allocation26_spill]] %s3797_s14 }
   0x9   :  { %19 = vsyncpa [#allocation3], 0 }
   0xa   :  { %20 = vsyncpa [#allocation6], 0 }
   0xb   :  { %22 = vsyncpa [#allocation6 + $0x1], 0 }
   0xc   :  { %23 = vsyncpa [#allocation4], 0  ;;  %s3211_s29 = smov 0   ;;  %s3213_s30 = smov 0  }
   0xd   :  { %s3215_s15 = smov 0   ;;  %s3217_s16 = smov 0  }
   0xe   :  { %s3219_s17 = smov 0   ;;  %s3221_s18 = smov 0  }
   0xf LB: > { %3820 = sst [smem:[#allocation12_spill]] %s3103_s30  ;;  %s38_s19 = sadd.s32 1, %s3115_s17  ;;  %s3119_s18 = sphi %s3221_s18, %s29_s18   ;;  %s3115_s17 = sphi %s3219_s17, %s3856_s17   ;;  %s3111_s16 = sphi %s3217_s16, %s3855_s16   ;;  %s3107_s15 = sphi %s3215_s15, %s3854_s15   ;;  %s3103_s30 = sphi %s3213_s30, %s3853_s30   ;;  %s3099_s29 = sphi %s3211_s29, %s3852_s29  }
  0x10   : > { %3821 = sst [smem:[#allocation13_spill]] %s3107_s15  ;;  %s204_s20 = sadd.s32 1, %s3107_s15 }
  0x11   : > { %3822 = sst [smem:[#allocation14_spill]] %s3115_s17  ;;  %p39_p0 = scmp.ge.s32.totalorder %s38_s19, 2 }
  0x12   : > { %3823 = sst [smem:[#allocation15_spill]] %s3119_s18  ;;  %p211_p1 = scmp.ne.s32.totalorder %s3107_s15, %s3103_s30 }
  0x13   : > { %p212_p2 = scmp.eq.s32.totalorder %s3119_s18, 0  ;;  %s3858_s19 = smov (%p39_p0, %s38_s19), 0 }
  0x14   : > { %3824 = sst [smem:[#allocation16_spill]] %s3858_s19  ;;  %p2826_p4 = scmp.lt.s32.totalorder %s3119_s18, 2 }
  0x15   : > { %p213_p3 = por %p212_p2, %p211_p1  ;;  %s201_s21 = ssub.s32 %s3115_s17, %s3858_s19 }
  0x16   : > { %s501_s22 = sand.u32 1, %s3119_s18   ;;  %p202_p5 = scmp.eq.s32.totalorder %s201_s21, 0 }
  0x17   : > { %s503_s23 = sand.u32 1, %s3107_s15   ;;  %s3800_s24 = sshll.u32 %s3115_s17, 8 }
  0x18   : > { %s3255_s25 = scalar_select %p202_p5, %s3107_s15, %s204_s20  }
  0x19   : > { %s3257_s26 = sshll.u32 %s503_s23, 4  ;;  %s3826_s6 = sld [smem:[#allocation23_spill]] }
  0x1a   : > { %3825 = sst [smem:[#allocation17_spill]] %s3255_s25  ;;  %p3266_p6 = pnand %p2826_p4, %p213_p3 }
  0x1b   : > { %s505_s20 = scalar_lea.vmem [#allocation5], %s3257_s26  ;;  %s3273_s23 = scalar_lea.sflag [#allocation6], %s501_s22 }
  0x1c   : > { %s512_s21 = sshll.u32 %s505_s20, 4  ;;  %p2949_p8 = pneg %p3266_p6  ;;  %s3271_s21 = int_to_ptr.vmem [resolvable:$true] %s512_s21 }
  0x1f   : > { %s3264_s14 = scalar_lea.hbm %s3826_s6, %s3800_s24  ;;  %s2952_s25 = scalar_lea.hbm %s3826_s6, 512 }
  0x20   : > { %s2947_s27 = scalar_lea.hbm %s3264_s14, 256  ;;  %p2953_p11 = scmp.lt.u32.totalorder %s3264_s14, %s3826_s6 }
  0x21   : > { %p2948_p7 = scmp.ne.s32.totalorder %s3264_s14, %s2947_s27  ;;  %p2954_p12 = scmp.lt.u32.totalorder %s2952_s25, %s2947_s27 }
  0x22   : > { %p2956_p0 = scmp.lt.u32.totalorder %s2947_s27, %s3264_s14 }
  0x23   : > { %p2950_p9 = pnand %p2949_p8, %p2948_p7  ;;  %p2955_p13 = por %p2954_p12, %p2953_p11 }
  0x25   : > { %p2951_p10 = pneg %p2950_p9  ;;  %p2957_p1 = por %p2956_p0, %p2955_p13 }
  0x27   : > { %p2958_p2 = pnand %p2957_p1, %p2951_p10 }
  0x29   : > { %2961 = shalt.err (!%p2958_p2)
}
  0x2a   : > { %s2962_s22 = scalar_lea.vmem %s3271_s21, 256  ;;  %s3121_s24 = smov [#allocation5]  }
  0x2b   : > { %p2963_p3 = scmp.ne.s32.totalorder %s3271_s21, %s2962_s22  ;;  %s2967_s20 = sshll.u32 %s3121_s24, 4  ;;  %s2968_s20 = int_to_ptr.vmem [resolvable:$false] %s2967_s20 }
  0x2c   : > { %s2969_s12 = scalar_lea.vmem %s2968_s20, 512  ;;  %p2970_p7 = scmp.lt.s32.totalorder %s3271_s21, %s2968_s20 }
  0x2d   : > { %p2965_p4 = pnand %p2963_p3, %p2949_p8  ;;  %p2971_p9 = scmp.lt.s32.totalorder %s2969_s12, %s2962_s22 }
  0x2f   : > { %p2966_p5 = pneg %p2965_p4  ;;  %p2972_p11 = por %p2971_p9, %p2970_p7 }
  0x31   : > { %p2973_p12 = pnand %p2972_p11, %p2966_p5 }
  0x33   : > { %2976 = shalt.err (!%p2973_p12)
}
  0x34   : > { %s3802_s15 = smov 64   ;;  %s3803_s25 = smov 4  }
  0x35   : > { %2821 = dma.hbm_to_vmem [thread:$0]  (!%p3266_p6), %s3264_s14, 256, %s3271_s21, %s3273_s23, %s3802_s15, %s3802_s15, %s3803_s25  }
  0x36   : > { %s544_s27 = scalar_lea.vmem [#allocation7], %s3257_s26  ;;  %s3306_s22 = sadd.s32 4294967295, %s3119_s18  }
  0x37   : > { %s551_s28 = sshll.u32 %s544_s27, 4  ;;  %3828 = sst [smem:[#allocation18_spill]] %s3306_s22  ;;  %s3330_s28 = int_to_ptr.vmem [resolvable:$true] %s551_s28 }
  0x38   : > { %p217_p10 = scmp.ne.s32.totalorder %s3103_s30, %s3099_s29  ;;  %p3804_p13 = scmp.eq.s32.totalorder %s3306_s22, 0 }
  0x39   : > { %p2491_p0 = scmp.ge.s32.totalorder %s3119_s18, 1  ;;  %p436_p1 = scmp.lt.s32.totalorder %s3119_s18, 3 }
  0x3a   : > { %p3315_p2 = por %p3804_p13, %p217_p10  ;;  %s3831_s14 = sshll.u32 %s3115_s17, 8 }
  0x3b   : > { %p3319_p3 = pnand %p2491_p0, %p436_p1  ;;  %s3832_s10 = sld [smem:[#allocation24_spill]] }
  0x3c   : > { %s3829_s24 = scalar_select %p3315_p2, 1, 0 }
  0x3d   : > { %s3830_s20 = scalar_select %p3319_p3, 1, 0 }
  0x3e   : > { %s3124_s29 = smov [#allocation2]   ;;  %p2814_p4 = pneg %p3319_p3 }
  0x3f   : > { %s451_s27 = sshll.u32 %s3124_s29, 4  ;;  %s3334_s27 = int_to_ptr.vmem [resolvable:$true] %s451_s27 }
  0x40   : > { %p3338_p5 = pnand %p2814_p4, %p3804_p13 }
  0x41   : > { %s3328_s12 = scalar_lea.hbm %s3832_s10, %s3831_s14  ;;  %s2982_s29 = scalar_lea.hbm %s3832_s10, 512 }
  0x42   : > { %s2977_s26 = scalar_lea.hbm %s3328_s12, 256  ;;  %p2983_p12 = scmp.lt.u32.totalorder %s3328_s12, %s3832_s10 }
  0x43   : > { %p2978_p7 = scmp.ne.s32.totalorder %s3328_s12, %s2977_s26  ;;  %p2984_p10 = scmp.lt.u32.totalorder %s2982_s29, %s2977_s26 }
  0x44   : > { %p2986_p1 = scmp.lt.u32.totalorder %s2977_s26, %s3328_s12 }
  0x45   : > { %p2980_p9 = pnand %p2978_p7, %p2949_p8  ;;  %p2985_p0 = por %p2984_p10, %p2983_p12 }
  0x47   : > { %p2981_p11 = pneg %p2980_p9  ;;  %p2987_p4 = por %p2986_p1, %p2985_p0 }
  0x49   : > { %p2988_p13 = pnand %p2987_p4, %p2981_p11 }
  0x4b   : > { %2991 = shalt.err (!%p2988_p13)
}
  0x4c   : > { %s2992_s17 = scalar_lea.vmem %s3330_s28, 256  ;;  %s3125_s14 = smov [#allocation7]  }
  0x4d   : > { %p2993_p7 = scmp.ne.s32.totalorder %s3330_s28, %s2992_s17  ;;  %s2997_s21 = sshll.u32 %s3125_s14, 4  ;;  %s2998_s21 = int_to_ptr.vmem [resolvable:$false] %s2997_s21 }
  0x4e   : > { %s2999_s6 = scalar_lea.vmem %s2998_s21, 512  ;;  %p3000_p3 = scmp.lt.s32.totalorder %s3330_s28, %s2998_s21 }
  0x4f   : > { %p2995_p9 = pnand %p2993_p7, %p2949_p8  ;;  %p3001_p12 = scmp.lt.s32.totalorder %s2999_s6, %s2992_s17 }
  0x51   : > { %p2996_p2 = pneg %p2995_p9  ;;  %p3002_p10 = por %p3001_p12, %p3000_p3 }
  0x53   : > { %p3003_p0 = pnand %p3002_p10, %p2996_p2 }
  0x55   : > { %3006 = shalt.err (!%p3003_p0)
}
  0x56   : > { %s3834_s25 = smov 4   ;;  %s3835_s26 = smov 64  }
  0x57   : > { %2824 = dma.hbm_to_vmem [thread:$0]  (!%p3266_p6), %s3328_s12, 256, %s3330_s28, %s3273_s23, %s3835_s26, %s3835_s26, %s3834_s25  }
  0x58   : > { %s3836_s0 = sld [smem:[#allocation19_spill]]  ;;  %p3009_p13 = pneg %p3338_p5 }
  0x5e   : > { %s3007_s14 = scalar_lea.hbm %s3836_s0, 256 }
  0x5f   : > { %p3008_p8 = scmp.ne.s32.totalorder %s3836_s0, %s3007_s14  ;;  %p3014_p11 = scmp.lt.u32.totalorder %s3007_s14, %s3836_s0 }
  0x61   : > { %p3010_p2 = pnand %p3009_p13, %p3008_p8 }
  0x63   : > { %p3011_p3 = pneg %p3010_p2 }
  0x65   : > { %p3016_p1 = pnand %p3014_p11, %p3011_p3 }
  0x67   : > { %3019 = shalt.err (!%p3016_p1)
}
  0x68   : > { %s3020_s23 = scalar_lea.vmem %s3334_s27, 256  ;;  %p3028_p9 = scmp.lt.s32.totalorder %s3334_s27, %s3334_s27 }
  0x69   : > { %p3021_p6 = scmp.ne.s32.totalorder %s3334_s27, %s3020_s23  ;;  %p3029_p12 = scmp.lt.s32.totalorder %s3020_s23, %s3020_s23 }
  0x6b   : > { %p3023_p4 = pnand %p3021_p6, %p3009_p13  ;;  %p3030_p10 = por %p3029_p12, %p3028_p9 }
  0x6d   : > { %p3024_p7 = pneg %p3023_p4 }
  0x6f   : > { %p3031_p0 = pnand %p3030_p10, %p3024_p7 }
  0x71   : > { %3034 = shalt.err (!%p3031_p0)
}
  0x72   : > { %s3126_s10 = smov 128   ;;  %s3127_s18 = smov 8  }
  0x73   : > { %2817 = dma.hbm_to_vmem [thread:$0]  (!%p3338_p5), %s3836_s0, 256, %s3334_s27, [#allocation3], %s3126_s10, %s3126_s10, %s3127_s18  }
  0x74   : > { %p3837_p8 = scmp.ne.s32.totalorder %s3830_s20, 0 }
  0x75   : > { %p3838_p13 = scmp.eq.s32.totalorder (!%p3837_p8), %s3306_s22, 0 }
  0x76   : > { %583 = sbr.rel (%p3837_p8) target bundleno = 4275 (0x10b3), region = 76 }
  0x7d   : > { %3086 = dma.done.wait (%p3838_p13), [#allocation3], 256   ;;  %p3839_p2 = pmov %p3838_p13 }
  0x7e   : > { %s589_s6 = sand.u32 1, %s3306_s22   ;;  %s591_s25 = sand.u32 1, %s3103_s30  }
  0x7f   : > { %3088 = vsyncadd (%p3839_p2), [#allocation3], 4294967040  ;;  %s3398_s26 = sshll.u32 %s591_s25, 4  ;;  %s590_s15 = scalar_lea.sflag [#allocation6], %s589_s6 }
  0x80   : > { %s3401_s29 = scalar_lea.vmem [#allocation5], %s3398_s26  ;;  %p3840_p5 = scmp.ne.s32.totalorder %s3829_s24, 0 }
  0x82   : > { %3090 = dma.done.wait (%p3840_p5), %s590_s15, 512  }
  0x83   : > { %3092 = vsyncadd (%p3840_p5), %s590_s15, 4294966784  ;;  %p689_p3 = scmp.lt.s32.totalorder %s3111_s16, 1  ;;  %s3841_s3 = sld [smem:[#allocation20_spill]] }
  0x84   : > { %s3842_s4 = sld [smem:[#allocation21_spill]]  ;;  %s3843_s5 = sld [smem:[#allocation22_spill]] }
  0x85   : > { %s3409_s20 = scalar_select %p689_p3, %s3111_s16, 1 }
  0x86   : > { %s602_s19 = scalar_lea.vmem [#allocation7], %s3398_s26  ;;  %p2512_p11 = scmp.ne.s32.totalorder %s3111_s16, 0 }
  0x87   : > { %s2563_s23 = sshll.u32 %s3409_s20, 4  ;;  %s715_s10 = scalar_lea.vmem %s3791_s8, %s3409_s20  ;;  %v736_v0 = vld [vmem:[#allocation2] sm:$0xff] (!%p2512_p11)  ;;  %vm738_vm0 = vcmask (!%p2512_p11), 261120   ;;  %v737_v1 = vld [vmem:[#allocation2 + $0x8] sm:$0xff] (!%p2512_p11) }
  0x88   : > { %s718_s12 = scalar_lea.vmem %s3792_s9, %s3409_s20  ;;  %s721_s30 = scalar_lea.vmem %s3794_s11, %s3409_s20  ;;  %739 = vst.msk [vmem:[#allocation8] sm:$0xff] (!%p2512_p11), %vm738_vm0, %v736_v0  ;;  %740 = vst.msk [vmem:[#allocation8 + $0x8] sm:$0xff] (!%p2512_p11), %vm738_vm0, %v737_v1 }
  0x89   : > { %s3427_s25 = scalar_lea.vmem %s3841_s3, %s2563_s23  ;;  %s2566_s15 = sshll.u32 %s3409_s20, 5 }
  0x8a   : > { %s3432_s14 = scalar_lea.vmem %s3842_s4, %s2563_s23  ;;  %s3437_s21 = scalar_lea.vmem %s3843_s5, %s2563_s23 }
  0x8b   : > { %s729_s22 = scalar_lea.vmem %s3796_s13, %s3409_s20  ;;  %s3844_s23 = sld [smem:[#allocation25_spill]] }
  0x8c   : > { %735 = sbr.rel (%p2512_p11) target bundleno = 147 (0x93), region = 92 }
  0x91   : > { %s3459_s5 = scalar_lea.vmem %s3844_s23, %s2566_s15 }
  0x93 PF: > { %v3463_v2 = vld [vmem:[#allocation8] sm:$0xff]  ;;  %vm745_vm1 = vcmask 261120   ;;  %v3465_v3 = vld [vmem:[#allocation8 + $0x8] sm:$0xff]  ;;  %v2891_v16 = vld [vmem:[%s3427_s25] sm:$0xff]   ;;  %v3128_v18 = vmov 0.0   ;;  %vm3129_vm2 = vmmov 0   ;;  %s3845_s16 = scalar_lea.vmem %s3784_s1, %s3409_s20  ;;  %s3847_s27 = scalar_lea.vmem %s3790_s7, %s3409_s20 }
  0x94   : > { %v746_v4 = vsel %vm745_vm1, %v3463_v2, 0.0  ;;  %v749_v5 = vsel %vm745_vm1, %v3465_v3, 0.0  ;;  %v2892_v17 = vld [vmem:[%s3437_s21] sm:$0xff]   ;;  %2624 = vmatprep.subr.bf16.mxu1 %v3128_v18  ;;  %2640 = vmatprep.subr.bf16.mxu0 %v3128_v18  ;;  %v2893_v19 = vld [vmem:[%s3427_s25 + $0x8] sm:$0xff]   ;;  %vm979_vm3 = vcmask 64512   ;;  %vm1099_vm4 = vcmask 1043456  }
  0x95   : > { %747 = vadd.xlane.f32.xlu0 %v746_v4  ;;  %2625 = vmatpush3.bf16.msra.mxu1 %v2891_v16  ;;  %v2894_v20 = vld [vmem:[%s3437_s21 + $0x8] sm:$0xff]   ;;  %v2513_v29 = vld [vmem:[%s3845_s16] ss:$0 sm:$0xff]  ;;  %s3846_s21 = scalar_lea.vmem %s3785_s2, %s3409_s20  ;;  %s3131_s17 = smov 112   ;;  %vm2223_vm5 = vcmask 523264  }
  0x96   : > { %2641 = vmatpush3.bf16.msra.mxu0 %v2892_v17  ;;  %2626 = vmatprep.subr.bf16.mxu1 %v3128_v18  ;;  %v2514_v33 = vld [vmem:[%s3846_s21] ss:$0 sm:$0xff]  ;;  %v2896_v39 = vld [vmem:[%s3432_s14 + $0x8] sm:$0xff]   ;;  %s3132_s18 = smov 104  }
  0x97   : > { %2642 = vmatprep.subr.bf16.mxu0 %v3128_v18  ;;  %2628 = vmatprep.mubr.msk.bf16.mxu1 %vm3129_vm2, %v3128_v18  ;;  %v2895_v37 = vld [vmem:[%s3432_s14] sm:$0xff]   ;;  %s3130_s14 = smov 120  }
  0x98   : > { %2644 = vmatprep.mubr.msk.bf16.mxu0 %vm3129_vm2, %v3128_v18 }
  0x99   : > { %750 = vadd.xlane.f32.xlu0 %v749_v5  ;;  %2627 = vmatpush3.bf16.msra.mxu1 %v2893_v19 }
  0x9a   : > { %2643 = vmatpush3.bf16.msra.mxu0 %v2894_v20  ;;  %2632 = vmatprep.subr.bf16.mxu1 %v3128_v18 }
  0x9b   : > { %2654 = vmatprep.subr.bf16.mxu0 %v3128_v18 }
 0x122   : > { %v748_v6 = vpop.xlane.xlu0 %747 }
 0x123   : > { %v753_v7 = vmul.f32 0.03125, %v748_v6 }
 0x125   : > { %v755_v8 = vsub.f32 %v3463_v2, %v753_v7 }
 0x126   : > { %v751_v9 = vpop.xlane.xlu0 %750 }
 0x127   : > { %v754_v10 = vmul.f32 0.03125, %v751_v9  ;;  %v757_v11 = vmul.f32 %v755_v8, %v755_v8 }
 0x129   : > { %v756_v12 = vsub.f32 %v3465_v3, %v754_v10  ;;  %v759_v13 = vsel %vm745_vm1, %v757_v11, 0.0 }
 0x12a   : > { %760 = vadd.xlane.f32.xlu1 %v759_v13 }
 0x12b   : > { %v758_v14 = vmul.f32 %v756_v12, %v756_v12 }
 0x12d   : > { %v762_v15 = vsel %vm745_vm1, %v758_v14, 0.0 }
 0x12e   : > { %763 = vadd.xlane.f32.xlu1 %v762_v15 }
 0x1b7   : > { %v761_v21 = vpop.xlane.xlu1 %760 }
 0x1b8   : > { %v765_v22 = vmul.f32 0.03125, %v761_v21 }
 0x1ba   : > { %v767_v23 = vadd.f32 1e-05, %v765_v22 }
 0x1bb   : > { %v764_v24 = vpop.xlane.xlu1 %763 }
 0x1bc   : > { %2903 = vrsqrt.f32 %v767_v23  ;;  %v766_v25 = vmul.f32 0.03125, %v764_v24  ;;  %v1190_v24 = vld [vmem:[%s3401_s29] sm:$0xf] }
 0x1be   : > { %v768_v26 = vadd.f32 1e-05, %v766_v25 }
 0x1c0   : > { %2905 = vrsqrt.f32 %v768_v26 }
 0x1c6   : > { %v2904_v27 = vpop.eup %2903 }
 0x1c7   : > { %v771_v28 = vmul.f32 %v2904_v27, %v755_v8 }
 0x1c9   : > { %v779_v32 = vmul.f32 %v2513_v29, %v771_v28 }
 0x1ca   : > { %v2906_v30 = vpop.eup %2905 }
 0x1cb   : > { %v772_v31 = vmul.f32 %v2906_v30, %v756_v12  ;;  %v787_v35 = vadd.f32 %v2514_v33, %v779_v32 }
 0x1cd   : > { %v780_v34 = vmul.f32 %v2513_v29, %v772_v31  ;;  %v1195_v29 = vsel %vm1099_vm4, %v1190_v24, 0 }
 0x1cf   : > { %v788_v36 = vadd.f32 %v2514_v33, %v780_v34 }
 0x1d1   : > { %v789_v38 = vpack.c.bf16 %v788_v36, %v787_v35 }
 0x1d3   : > { %2629 = vmatmul.mubr.msk.bf16.vlgmr.msra.gmra.mrb[0].mxu1 %vm745_vm1, %v789_v38  ;;  %2645 = vmatmul.mubr.msk.bf16.vlgmr.msra.gmra.mrb[0].mxu0 %vm745_vm1, %v789_v38 }
 0x1d4   : > { %2633 = vmatpush3.bf16.msra.mxu1 %v2895_v37  ;;  %2636 = vmatprep.mubr.msk.bf16.mxu1 %vm3129_vm2, %v3128_v18 }
 0x1d5   : > { %2634 = vmatprep.subr.bf16.mxu1 %v3128_v18  ;;  %2656 = vmatprep.mubr.msk.bf16.mxu0 %vm3129_vm2, %v3128_v18 }
 0x1d8   : > { %2635 = vmatpush3.bf16.msra.mxu1 %v2896_v39 }
 0x1d9   : > { %2648 = vmatprep.subr.bf16.mxu1 %v3128_v18 }
 0x1db   : > { %2637 = vmatmul.mubr.msk.bf16.vlgmr.msra.gmra.mrb[4].mxu1 %vm745_vm1, %v789_v38 }
 0x1dc   : > { %2650 = vmatprep.mubr.msk.bf16.mxu1 %vm3129_vm2, %v3128_v18 }
 0x2a6   : > { %v843_v40 = vpop.f32.mrb[0].mxu1  ;;  %v957_v41 = vpop.f32.mrb[0].mxu0 }
 0x2a7   : > { %v2630_v42 = vpop.f32.mrb[1].mxu1  ;;  %v2646_v43 = vpop.f32.mrb[1].mxu0  ;;  %v3521_v56 = vpack.c.bf16 %v957_v41, %v957_v41  ;;  %v3524_v57 = vpack.c.bf16 %v843_v40, %v843_v40 }
 0x2a8   : > { %v846_v44 = vpop.f32.mrb[2].mxu1  ;;  %v960_v45 = vpop.f32.mrb[2].mxu0 }
 0x2a9   : > { %v2631_v46 = vpop.f32.mrb[3].mxu1  ;;  %v2647_v47 = vpop.f32.mrb[3].mxu0  ;;  %v3526_v58 = vpack.c.bf16 %v960_v45, %v960_v45  ;;  %v3528_v59 = vpack.c.bf16 %v846_v44, %v846_v44  ;;  %v1101_v60 = vsel %vm1099_vm4, %v3521_v56, 0 }
 0x2ab   : > { %v1147_v61 = vsel %vm1099_vm4, %v3526_v58, 0 }
 0x2ae   : > { %v900_v48 = vpop.f32.mrb[4].mxu1 }
 0x2af   : > { %v3512_v49 = vpack.c.bf16 %v900_v48, %v900_v48  ;;  %v2638_v50 = vpop.f32.mrb[5].mxu1 }
 0x2b0   : > { %v903_v51 = vpop.f32.mrb[6].mxu1 }
 0x2b1   : > { %v3514_v52 = vpack.c.bf16 %v903_v51, %v903_v51  ;;  %v2639_v53 = vpop.f32.mrb[7].mxu1  ;;  %v984_v54 = vsel %vm979_vm3, %v3512_v49, 0 }
 0x2b2   : > { %2649 = vmatpush3.bf16.xpose.msra.mxu1 %v984_v54 }
 0x2b3   : > { %v1030_v55 = vsel %vm979_vm3, %v3514_v52, 0  ;;  %2660 = vmatprep.subr.bf16.mxu1 %v3128_v18 }
 0x2b4   : > { %2655 = vmatpush3.bf16.xpose.msra.mxu0 %v1030_v55 }
 0x2b5   : > { %2666 = vmatprep.subr.bf16.mxu0 %v3128_v18 }
 0x2b9   : > { %2651 = vmatmul.mubr.msk.bf16.vlgmr.msra.gmra.mrb[8].mxu1 %vm979_vm3, %v3524_v57 }
 0x2ba   : > { %2661 = vmatpush3.bf16.msra.mxu1 %v1101_v60  ;;  %2662 = vmatprep.mubr.msk.bf16.mxu1 %vm3129_vm2, %v3128_v18 }
 0x2bb   : > { %2657 = vmatmul.mubr.msk.bf16.vlgmr.msra.gmra.mrb[4].mxu0 %vm979_vm3, %v3528_v59  ;;  %2672 = vmatprep.subr.bf16.mxu1 %v3128_v18 }
 0x2bc   : > { %2667 = vmatpush3.bf16.msra.mxu0 %v1147_v61  ;;  %2668 = vmatprep.mubr.msk.bf16.mxu0 %vm3129_vm2, %v3128_v18 }
 0x2bd   : > { %2678 = vmatprep.subr.bf16.mxu0 %v3128_v18 }
 0x38c   : > { %v1020_v62 = vpop.f32.mrb[8].mxu1 }
 0x38d   : > { %v2652_v63 = vpop.f32.mrb[9].mxu1  ;;  %v1072_v0 = vsel %vm979_vm3, %v1020_v62, -inf }
 0x38e   : > { %v1066_v1 = vpop.f32.mrb[4].mxu0  ;;  %1073 = vmax.xlane.f32.xlu0 %v1072_v0  ;;  %v1023_v4 = vpop.f32.mrb[10].mxu1 }
 0x38f   : > { %v2653_v5 = vpop.f32.mrb[11].mxu1  ;;  %v2658_v6 = vpop.f32.mrb[5].mxu0  ;;  %v1075_v7 = vsel %vm979_vm3, %v1066_v1, -inf }
 0x390   : > { %1076 = vmax.xlane.f32.xlu1 %v1075_v7  ;;  %v1069_v8 = vpop.f32.mrb[6].mxu0 }
 0x391   : > { %v2659_v9 = vpop.f32.mrb[7].mxu0 }
 0x41b   : > { %v1074_v10 = vpop.xlane.xlu0 %1073 }
 0x41c   : > { %v1078_v11 = vsub.f32 %v1020_v62, %v1074_v10 }
 0x41d   : > { %v1077_v12 = vpop.xlane.xlu1 %1076 }
 0x41e   : > { %v1080_v13 = vmul.f32 1.442695, %v1078_v11  ;;  %v1079_v14 = vsub.f32 %v1066_v1, %v1077_v12 }
 0x420   : > { %2907 = vpow2.f32 %v1080_v13  ;;  %v1082_v15 = vmul.f32 1.442695, %v1079_v14 }
 0x422   : > { %2909 = vpow2.f32 %v1082_v15 }
 0x42a   : > { %v2908_v16 = vpop.eup %2907 }
 0x42b   : > { %v1084_v17 = vsel %vm979_vm3, %v2908_v16, 0.0 }
 0x42c   : > { %v2910_v19 = vpop.eup %2909  ;;  %1085 = vadd.xlane.f32.xlu0 %v1084_v17 }
 0x42d   : > { %v1087_v20 = vsel %vm979_vm3, %v2910_v19, 0.0 }
 0x42e   : > { %1088 = vadd.xlane.f32.xlu1 %v1087_v20 }
 0x43f   : > { %1241 = vrot.lane.b32.xlu1 %v3524_v57, %s3130_s14 }
 0x442   : > { %1244 = vrot.lane.b32.xlu0 %v3512_v49, %s3130_s14 }
 0x443   : > { %1296 = vrot.lane.b32.xlu1 %v3514_v52, %s3130_s14 }
 0x447   : > { %1293 = vrot.lane.b32.xlu1 %v3528_v59, %s3130_s14 }
 0x4b9   : > { %v1086_v21 = vpop.xlane.xlu0 %1085 }
 0x4ba   : > { %2911 = vrcp.f32 %v1086_v21 }
 0x4bb   : > { %v1089_v22 = vpop.xlane.xlu1 %1088 }
 0x4bc   : > { %2913 = vrcp.f32 %v1089_v22 }
 0x4bd   : > { %v1245_v30 = vpop.permute.xlu0 %1244 }
 0x4be   : > { %v1250_v32 = vsel %vm979_vm3, %v1245_v30, 0 }
 0x4bf   : > { %v1242_v33 = vpop.permute.xlu1 %1241 }
 0x4c3   : > { %v1297_v35 = vpop.permute.xlu1 %1296 }
 0x4c4   : > { %v2912_v23 = vpop.eup %2911  ;;  %v1302_v43 = vsel %vm979_vm3, %v1297_v35, 0 }
 0x4c5   : > { %v1092_v25 = vmul.f32 %v2912_v23, %v2908_v16 }
 0x4c6   : > { %v2914_v26 = vpop.eup %2913 }
 0x4c7   : > { %v1093_v27 = vmul.f32 %v2914_v26, %v2910_v19  ;;  %v1094_v28 = vpack.c.bf16 %v1092_v25, %v1092_v25  ;;  %v1294_v48 = vpop.permute.xlu1 %1293 }
 0x4c9   : > { %2663 = vmatmul.mubr.msk.bf16.vlgmr.msra.gmra.mrb[12].mxu1 %vm979_vm3, %v1094_v28  ;;  %v1095_v31 = vpack.c.bf16 %v1093_v27, %v1093_v27 }
 0x4ca   : > { %2673 = vmatpush3.bf16.msra.mxu1 %v1195_v29  ;;  %2674 = vmatprep.mubr.msk.bf16.mxu1 %vm3129_vm2, %v3128_v18 }
 0x4cb   : > { %2669 = vmatmul.mubr.msk.bf16.vlgmr.msra.gmra.mrb[8].mxu0 %vm979_vm3, %v1095_v31  ;;  %2684 = vmatprep.subr.bf16.mxu1 %v3128_v18 }
 0x4cc   : > { %2679 = vmatpush3.bf16.xpose.msra.mxu0 %v1250_v32  ;;  %2680 = vmatprep.mubr.msk.bf16.mxu0 %vm3129_vm2, %v3128_v18 }
 0x4cd   : > { %2690 = vmatprep.subr.bf16.mxu0 %v3128_v18 }
 0x4d3   : > { %2681 = vmatmul.mubr.msk.bf16.vlgmr.msra.gmra.mrb[12].mxu0 %vm979_vm3, %v1242_v33 }
 0x4d4   : > { %2692 = vmatprep.mubr.msk.bf16.mxu0 %vm3129_vm2, %v3128_v18 }
 0x59c   : > { %v1137_v34 = vpop.f32.mrb[12].mxu1 }
 0x59d   : > { %v2664_v36 = vpop.f32.mrb[13].mxu1 }
 0x59e   : > { %v1140_v37 = vpop.f32.mrb[14].mxu1  ;;  %v1183_v38 = vpop.f32.mrb[8].mxu0 }
 0x59f   : > { %v1189_v39 = vpack.c.bf16 %v1183_v38, %v1137_v34  ;;  %v2665_v40 = vpop.f32.mrb[15].mxu1  ;;  %v2670_v41 = vpop.f32.mrb[9].mxu0 }
 0x5a0   : > { %v1186_v42 = vpop.f32.mrb[10].mxu0 }
 0x5a1   : > { %v2671_v44 = vpop.f32.mrb[11].mxu0  ;;  %2675 = vmatmul.mubr.msk.bf16.vlgmr.msra.gmra.mrb[16].mxu1 %vm979_vm3, %v1189_v39  ;;  %v1467_v42 = vld [vmem:[%s3401_s29 + $0x4] sm:$0xf] }
 0x5a2   : > { %2685 = vmatpush3.bf16.xpose.msra.mxu1 %v1302_v43  ;;  %2686 = vmatprep.mubr.msk.bf16.mxu1 %vm3129_vm2, %v3128_v18  ;;  %v1472_v43 = vsel %vm1099_vm4, %v1467_v42, 0 }
 0x5a3   : > { %2696 = vmatprep.subr.bf16.mxu1 %v3128_v18 }
 0x5a6   : > { %v1286_v45 = vpop.f32.mrb[12].mxu0 }
 0x5a7   : > { %v2682_v46 = vpop.f32.mrb[13].mxu0  ;;  %v1344_v47 = vsel %vm979_vm3, %v1286_v45, -inf }
 0x5a8   : > { %1345 = vmax.xlane.f32.xlu0 %v1344_v47  ;;  %v1289_v50 = vpop.f32.mrb[14].mxu0 }
 0x5a9   : > { %v2683_v51 = vpop.f32.mrb[15].mxu0  ;;  %2687 = vmatmul.mubr.msk.bf16.vlgmr.msra.gmra.mrb[20].mxu1 %vm979_vm3, %v1294_v48 }
 0x5aa   : > { %2698 = vmatprep.mubr.msk.bf16.mxu1 %vm3129_vm2, %v3128_v18 }
 0x5be   : > { %1369 = vrot.lane.b32.xlu0 %v3521_v56, %s3130_s14 }
 0x5c2   : > { %1517 = vrot.lane.b32.xlu0 %v3524_v57, %s3131_s17 }
 0x5c6   : > { %1567 = vrot.lane.b32.xlu0 %v3528_v59, %s3131_s17 }
 0x635   : > { %v1346_v53 = vpop.xlane.xlu0 %1345 }
 0x636   : > { %v1350_v54 = vsub.f32 %v1286_v45, %v1346_v53 }
 0x638   : > { %v1352_v55 = vmul.f32 1.442695, %v1350_v54 }
 0x639   : > { %v1370_v60 = vpop.permute.xlu0 %1369 }
 0x63a   : > { %2915 = vpow2.f32 %v1352_v55  ;;  %v1375_v61 = vsel %vm1099_vm4, %v1370_v60, 0 }
 0x63b   : > { %2691 = vmatpush3.bf16.msra.mxu0 %v1375_v61 }
 0x63c   : > { %2708 = vmatprep.subr.bf16.mxu0 %v3128_v18 }
 0x63d   : > { %v1518_v14 = vpop.permute.xlu0 %1517 }
 0x641   : > { %v1568_v16 = vpop.permute.xlu0 %1567 }
 0x644   : > { %v2916_v62 = vpop.eup %2915 }
 0x645   : > { %v1356_v63 = vsel %vm979_vm3, %v2916_v62, 0.0 }
 0x646   : > { %1357 = vadd.xlane.f32.xlu1 %v1356_v63 }
 0x657   : > { %1519 = vrot.lane.b32.xlu1 %v3512_v49, %s3131_s17 }
 0x65b   : > { %1569 = vrot.lane.b32.xlu1 %v3514_v52, %s3131_s17 }
 0x67c   : > { %v1338_v0 = vpop.f32.mrb[20].mxu1 }
 0x67d   : > { %v2688_v1 = vpop.f32.mrb[21].mxu1  ;;  %v1347_v4 = vsel %vm979_vm3, %v1338_v0, -inf }
 0x67e   : > { %v1341_v5 = vpop.f32.mrb[22].mxu1 }
 0x67f   : > { %1348 = vmax.xlane.f32.xlu1 %v1347_v4  ;;  %v2689_v6 = vpop.f32.mrb[23].mxu1 }
 0x6d3   : > { %v1358_v7 = vpop.xlane.xlu1 %1357 }
 0x6d4   : > { %2917 = vrcp.f32 %v1358_v7 }
 0x6d7   : > { %v1520_v10 = vpop.permute.xlu1 %1519 }
 0x6d8   : > { %v1525_v12 = vsel %vm979_vm3, %v1520_v10, 0 }
 0x6db   : > { %v1570_v13 = vpop.permute.xlu1 %1569 }
 0x6dc   : > { %v1575_v15 = vsel %vm979_vm3, %v1570_v13, 0 }
 0x6de   : > { %v2918_v8 = vpop.eup %2917 }
 0x6df   : > { %v1364_v9 = vmul.f32 %v2918_v8, %v2916_v62 }
 0x6e1   : > { %v1366_v11 = vpack.c.bf16 %v1364_v9, %v1364_v9 }
 0x6e3   : > { %2693 = vmatmul.mubr.msk.bf16.vlgmr.msra.gmra.mrb[16].mxu0 %vm979_vm3, %v1366_v11 }
 0x6e4   : > { %2709 = vmatpush3.bf16.xpose.msra.mxu0 %v1525_v12  ;;  %2710 = vmatprep.mubr.msk.bf16.mxu0 %vm3129_vm2, %v3128_v18 }
 0x6e5   : > { %2714 = vmatprep.subr.bf16.mxu0 %v3128_v18 }
 0x6eb   : > { %2711 = vmatmul.mubr.msk.bf16.vlgmr.msra.gmra.mrb[20].mxu0 %vm979_vm3, %v1518_v14 }
 0x6ec   : > { %2715 = vmatpush3.bf16.xpose.msra.mxu0 %v1575_v15  ;;  %2716 = vmatprep.mubr.msk.bf16.mxu0 %vm3129_vm2, %v3128_v18 }
 0x6ed   : > { %2726 = vmatprep.subr.bf16.mxu0 %v3128_v18 }
 0x6f3   : > { %2717 = vmatmul.mubr.msk.bf16.vlgmr.msra.gmra.mrb[24].mxu0 %vm979_vm3, %v1568_v16  ;;  %v1738_v16 = vld [vmem:[%s3401_s29 + $0x8] sm:$0xf] }
 0x6f4   : > { %2728 = vmatprep.mubr.msk.bf16.mxu0 %vm3129_vm2, %v3128_v18 }
 0x70c   : > { %v1349_v17 = vpop.xlane.xlu1 %1348 }
 0x70d   : > { %v1351_v19 = vsub.f32 %v1338_v0, %v1349_v17  ;;  %v1743_v17 = vsel %vm1099_vm4, %v1738_v16, 0 }
 0x70f   : > { %v1354_v20 = vmul.f32 1.442695, %v1351_v19 }
 0x711   : > { %2919 = vpow2.f32 %v1354_v20 }
 0x71b   : > { %v2920_v21 = vpop.eup %2919 }
 0x71c   : > { %v1359_v22 = vsel %vm979_vm3, %v2920_v21, 0.0 }
 0x71d   : > { %1360 = vadd.xlane.f32.xlu0 %v1359_v22 }
 0x733   : > { %1418 = vrot.lane.b32.xlu0 %v3526_v58, %s3130_s14 }
 0x737   : > { %1689 = vrot.lane.b32.xlu0 %v3526_v58, %s3131_s17 }
 0x73b   : > { %1790 = vrot.lane.b32.xlu0 %v3512_v49, %s3132_s18 }
 0x73f   : > { %1840 = vrot.lane.b32.xlu0 %v3514_v52, %s3132_s18 }
 0x743   : > { %1788 = vrot.lane.b32.xlu0 %v3524_v57, %s3132_s18 }
 0x7aa   : > { %v1361_v23 = vpop.xlane.xlu0 %1360 }
 0x7ab   : > { %2921 = vrcp.f32 %v1361_v23 }
 0x7ae   : > { %v1419_v24 = vpop.permute.xlu0 %1418 }
 0x7af   : > { %v1424_v25 = vsel %vm1099_vm4, %v1419_v24, 0 }
 0x7b0   : > { %2697 = vmatpush3.bf16.msra.mxu1 %v1424_v25 }
 0x7b1   : > { %2702 = vmatprep.subr.bf16.mxu1 %v3128_v18 }
 0x7b2   : > { %v1690_v26 = vpop.permute.xlu0 %1689 }
 0x7b3   : > { %v1695_v27 = vsel %vm1099_vm4, %v1690_v26, 0 }
 0x7b4   : > { %2727 = vmatpush3.bf16.msra.mxu0 %v1695_v27 }
 0x7b5   : > { %v2922_v28 = vpop.eup %2921  ;;  %2738 = vmatprep.subr.bf16.mxu0 %v3128_v18 }
 0x7b6   : > { %v1365_v49 = vmul.f32 %v2922_v28, %v2920_v21  ;;  %v1411_v52 = vpop.f32.mrb[16].mxu0  ;;  %v1791_v10 = vpop.permute.xlu0 %1790 }
 0x7b7   : > { %v2694_v29 = vpop.f32.mrb[17].mxu0  ;;  %v1796_v13 = vsel %vm979_vm3, %v1791_v10, 0 }
 0x7b8   : > { %v1414_v30 = vpop.f32.mrb[18].mxu0  ;;  %v1367_v57 = vpack.c.bf16 %v1365_v49, %v1365_v49 }
 0x7b9   : > { %v2695_v31 = vpop.f32.mrb[19].mxu0 }
 0x7ba   : > { %2699 = vmatmul.mubr.msk.bf16.vlgmr.msra.gmra.mrb[24].mxu1 %vm979_vm3, %v1367_v57  ;;  %v1841_v14 = vpop.permute.xlu0 %1840 }
 0x7bb   : > { %2704 = vmatprep.mubr.msk.bf16.mxu1 %vm3129_vm2, %v3128_v18  ;;  %2703 = vmatpush3.bf16.msra.mxu1 %v1472_v43  ;;  %v1846_v27 = vsel %vm979_vm3, %v1841_v14, 0 }
 0x7bc   : > { %2720 = vmatprep.subr.bf16.mxu1 %v3128_v18 }
 0x7be   : > { %v1561_v32 = vpop.f32.mrb[20].mxu0  ;;  %v1789_v15 = vpop.permute.xlu0 %1788 }
 0x7bf   : > { %v2712_v33 = vpop.f32.mrb[21].mxu0  ;;  %v1617_v34 = vsel %vm979_vm3, %v1561_v32, -inf }
 0x7c0   : > { %v1564_v35 = vpop.f32.mrb[22].mxu0  ;;  %1618 = vmax.xlane.f32.xlu1 %v1617_v34 }
 0x7c1   : > { %v2713_v36 = vpop.f32.mrb[23].mxu0 }
 0x7c6   : > { %v1611_v37 = vpop.f32.mrb[24].mxu0 }
 0x7c7   : > { %v2718_v38 = vpop.f32.mrb[25].mxu0  ;;  %v1620_v39 = vsel %vm979_vm3, %v1611_v37, -inf }
 0x7c8   : > { %v1614_v40 = vpop.f32.mrb[26].mxu0  ;;  %1621 = vmax.xlane.f32.xlu1 %v1620_v39 }
 0x7c9   : > { %v2719_v41 = vpop.f32.mrb[27].mxu0 }
 0x84d   : > { %v1619_v44 = vpop.xlane.xlu1 %1618 }
 0x84e   : > { %v1623_v45 = vsub.f32 %v1561_v32, %v1619_v44 }
 0x850   : > { %v1625_v46 = vmul.f32 1.442695, %v1623_v45 }
 0x852   : > { %2923 = vpow2.f32 %v1625_v46 }
 0x855   : > { %v1622_v47 = vpop.xlane.xlu1 %1621 }
 0x856   : > { %v1624_v48 = vsub.f32 %v1611_v37, %v1622_v47 }
 0x858   : > { %v1627_v50 = vmul.f32 1.442695, %v1624_v48 }
 0x85a   : > { %2925 = vpow2.f32 %v1627_v50 }
 0x85c   : > { %v2924_v51 = vpop.eup %2923 }
 0x85d   : > { %v1629_v53 = vsel %vm979_vm3, %v2924_v51, 0.0 }
 0x85e   : > { %1630 = vadd.xlane.f32.xlu1 %v1629_v53 }
 0x864   : > { %v2926_v54 = vpop.eup %2925 }
 0x865   : > { %v1632_v55 = vsel %vm979_vm3, %v2926_v54, 0.0 }
 0x866   : > { %1633 = vadd.xlane.f32.xlu1 %v1632_v55 }
 0x877   : > { %1641 = vrot.lane.b32.xlu1 %v3521_v56, %s3131_s17 }
 0x87b   : > { %1838 = vrot.lane.b32.xlu1 %v3528_v59, %s3132_s18 }
 0x88d   : > { %v1460_v60 = vpop.f32.mrb[24].mxu1 }
 0x88e   : > { %v1466_v61 = vpack.c.bf16 %v1460_v60, %v1411_v52  ;;  %v2700_v62 = vpop.f32.mrb[25].mxu1 }
 0x88f   : > { %v1463_v63 = vpop.f32.mrb[26].mxu1 }
 0x890   : > { %v2701_v0 = vpop.f32.mrb[27].mxu1  ;;  %2705 = vmatmul.mubr.msk.bf16.vlgmr.msra.gmra.mrb[16].mxu1 %vm979_vm3, %v1466_v61  ;;  %v2009_v63 = vld [vmem:[%s3401_s29 + $0xc] sm:$0xf] }
 0x891   : > { %2722 = vmatprep.mubr.msk.bf16.mxu1 %vm3129_vm2, %v3128_v18  ;;  %v2014_v0 = vsel %vm1099_vm4, %v2009_v63, 0 }
 0x8eb   : > { %v1631_v1 = vpop.xlane.xlu1 %1630 }
 0x8ec   : > { %2927 = vrcp.f32 %v1631_v1 }
 0x8f3   : > { %v1634_v4 = vpop.xlane.xlu1 %1633 }
 0x8f4   : > { %2929 = vrcp.f32 %v1634_v4 }
 0x8f6   : > { %v2928_v5 = vpop.eup %2927 }
 0x8f7   : > { %v1637_v6 = vmul.f32 %v2928_v5, %v2924_v51  ;;  %v1642_v7 = vpop.permute.xlu1 %1641 }
 0x8f8   : > { %v1647_v8 = vsel %vm1099_vm4, %v1642_v7, 0 }
 0x8f9   : > { %2721 = vmatpush3.bf16.msra.mxu1 %v1647_v8  ;;  %v1639_v59 = vpack.c.bf16 %v1637_v6, %v1637_v6 }
 0x8fa   : > { %2732 = vmatprep.subr.bf16.mxu1 %v3128_v18 }
 0x8fb   : > { %v1839_v30 = vpop.permute.xlu1 %1838 }
 0x8fc   : > { %2723 = vmatmul.mubr.msk.bf16.vlgmr.msra.gmra.mrb[28].mxu1 %vm979_vm3, %v1639_v59 }
 0x8fd   : > { %2734 = vmatprep.mubr.msk.bf16.mxu1 %vm3129_vm2, %v3128_v18  ;;  %2733 = vmatpush3.bf16.msra.mxu1 %v1743_v17 }
 0x8fe   : > { %v2930_v9 = vpop.eup %2929  ;;  %2744 = vmatprep.subr.bf16.mxu1 %v3128_v18 }
 0x8ff   : > { %v1638_v11 = vmul.f32 %v2930_v9, %v2926_v54 }
 0x901   : > { %v1640_v12 = vpack.c.bf16 %v1638_v11, %v1638_v11  ;;  %v2524_v11 = vld [vmem:[%s3847_s27] ss:$0 sm:$0xff] }
 0x903   : > { %2729 = vmatmul.mubr.msk.bf16.vlgmr.msra.gmra.mrb[28].mxu0 %vm979_vm3, %v1640_v12  ;;  %v977_v12 = vadd.f32 %v2524_v11, %v3463_v2 }
 0x904   : > { %2739 = vmatpush3.bf16.xpose.msra.mxu0 %v1796_v13  ;;  %2740 = vmatprep.mubr.msk.bf16.mxu0 %vm3129_vm2, %v3128_v18  ;;  %v978_v13 = vadd.f32 %v2524_v11, %v3465_v3 }
 0x905   : > { %2750 = vmatprep.subr.bf16.mxu0 %v3128_v18 }
 0x90b   : > { %2741 = vmatmul.mubr.msk.bf16.vlgmr.msra.gmra.mrb[32].mxu0 %vm979_vm3, %v1789_v15 }
 0x90c   : > { %2752 = vmatprep.mubr.msk.bf16.mxu0 %vm3129_vm2, %v3128_v18 }
 0x9cf   : > { %v1683_v19 = vpop.f32.mrb[28].mxu1 }
 0x9d0   : > { %v2724_v20 = vpop.f32.mrb[29].mxu1 }
 0x9d1   : > { %v1686_v21 = vpop.f32.mrb[30].mxu1 }
 0x9d2   : > { %v2725_v22 = vpop.f32.mrb[31].mxu1 }
 0x9d6   : > { %v1731_v23 = vpop.f32.mrb[28].mxu0 }
 0x9d7   : > { %v1737_v24 = vpack.c.bf16 %v1731_v23, %v1683_v19  ;;  %v2730_v25 = vpop.f32.mrb[29].mxu0 }
 0x9d8   : > { %v1734_v26 = vpop.f32.mrb[30].mxu0 }
 0x9d9   : > { %v2731_v28 = vpop.f32.mrb[31].mxu0  ;;  %2735 = vmatmul.mubr.msk.bf16.vlgmr.msra.gmra.mrb[16].mxu1 %vm979_vm3, %v1737_v24 }
 0x9da   : > { %2745 = vmatpush3.bf16.xpose.msra.mxu1 %v1846_v27  ;;  %2746 = vmatprep.mubr.msk.bf16.mxu1 %vm3129_vm2, %v3128_v18 }
 0x9db   : > { %2756 = vmatprep.subr.bf16.mxu1 %v3128_v18 }
 0x9de   : > { %v1832_v49 = vpop.f32.mrb[32].mxu0 }
 0x9df   : > { %v2742_v52 = vpop.f32.mrb[33].mxu0  ;;  %v1888_v29 = vsel %vm979_vm3, %v1832_v49, -inf }
 0x9e0   : > { %1889 = vmax.xlane.f32.xlu0 %v1888_v29  ;;  %v1835_v57 = vpop.f32.mrb[34].mxu0  ;;  %v2897_v29 = vld [vmem:[%s602_s19] sm:$0xff]  }
 0x9e1   : > { %v2743_v31 = vpop.f32.mrb[35].mxu0  ;;  %2747 = vmatmul.mubr.msk.bf16.vlgmr.msra.gmra.mrb[32].mxu1 %vm979_vm3, %v1839_v30  ;;  %v2898_v30 = vld [vmem:[%s602_s19 + $0x8] sm:$0xff]   ;;  %s3133_s19 = smov [#allocation8]  }
 0x9e2   : > { %2758 = vmatprep.mubr.msk.bf16.mxu1 %vm3129_vm2, %v3128_v18  ;;  %s2281_s3 = sshll.u32 %s3133_s19, 4  ;;  %s2282_s3 = int_to_ptr.vmem [resolvable:$true] %s2281_s3 }
 0x9e3   : > { %p3042_p9 = scmp.lt.s32.totalorder %s2282_s3, %s2282_s3 }
 0xa6d   : > { %v1890_v32 = vpop.xlane.xlu0 %1889 }
 0xa6e   : > { %v1894_v33 = vsub.f32 %v1832_v49, %v1890_v32 }
 0xa70   : > { %v1896_v34 = vmul.f32 1.442695, %v1894_v33 }
 0xa72   : > { %2931 = vpow2.f32 %v1896_v34 }
 0xa7c   : > { %v2932_v35 = vpop.eup %2931 }
 0xa7d   : > { %v1900_v36 = vsel %vm979_vm3, %v2932_v35, 0.0 }
 0xa7e   : > { %1901 = vadd.xlane.f32.xlu0 %v1900_v36 }
 0xab4   : > { %v1882_v37 = vpop.f32.mrb[32].mxu1 }
 0xab5   : > { %v2748_v38 = vpop.f32.mrb[33].mxu1  ;;  %v1891_v39 = vsel %vm979_vm3, %v1882_v37, -inf }
 0xab6   : > { %1892 = vmax.xlane.f32.xlu1 %v1891_v39  ;;  %v1885_v40 = vpop.f32.mrb[34].mxu1 }
 0xab7   : > { %v2749_v41 = vpop.f32.mrb[35].mxu1 }
 0xac7   : > { %1960 = vrot.lane.b32.xlu1 %v3526_v58, %s3132_s18 }
 0xb0b   : > { %v1902_v50 = vpop.xlane.xlu0 %1901 }
 0xb43   : > { %v1893_v42 = vpop.xlane.xlu1 %1892 }
 0xb44   : > { %v1895_v43 = vsub.f32 %v1882_v37, %v1893_v42  ;;  %v2545_v37 = vld [vmem:[%s715_s10] ss:$0 sm:$0xff] }
 0xb45   : > { %v2546_v42 = vld [vmem:[%s718_s12] ss:$0 sm:$0xff] }
 0xb46   : > { %v1898_v44 = vmul.f32 1.442695, %v1895_v43 }
 0xb47   : > { %v1961_v45 = vpop.permute.xlu1 %1960 }
 0xb48   : > { %2933 = vpow2.f32 %v1898_v44  ;;  %v1966_v46 = vsel %vm1099_vm4, %v1961_v45, 0 }
 0xb49   : > { %2757 = vmatpush3.bf16.msra.mxu1 %v1966_v46  ;;  %2935 = vrcp.f32 %v1902_v50  ;;  %v2901_v50 = vld [vmem:[%s3459_s5 + $0x10] sm:$0xff]  }
 0xb4a   : > { %2762 = vmatprep.subr.bf16.mxu1 %v3128_v18 }
 0xb52   : > { %v2934_v47 = vpop.eup %2933 }
 0xb53   : > { %v1903_v48 = vsel %vm979_vm3, %v2934_v47, 0.0  ;;  %v2936_v58 = vpop.eup %2935 }
 0xb54   : > { %1904 = vadd.xlane.f32.xlu0 %v1903_v48  ;;  %v1908_v53 = vmul.f32 %v2936_v58, %v2932_v35  ;;  %v2900_v48 = vld [vmem:[%s3459_s5 + $0x8] sm:$0xff]   ;;  %v2902_v58 = vld [vmem:[%s3459_s5 + $0x18] sm:$0xff]  }
 0xb56   : > { %v1910_v60 = vpack.c.bf16 %v1908_v53, %v1908_v53 }
 0xb6a   : > { %1912 = vrot.lane.b32.xlu0 %v3521_v56, %s3132_s18 }
 0xbe1   : > { %v1905_v51 = vpop.xlane.xlu0 %1904 }
 0xbe2   : > { %2937 = vrcp.f32 %v1905_v51  ;;  %v2548_v51 = vld [vmem:[%s721_s30] ss:$0 sm:$0xff] }
 0xbe5   : > { %v1913_v54 = vpop.permute.xlu0 %1912 }
 0xbe6   : > { %v1918_v55 = vsel %vm1099_vm4, %v1913_v54, 0 }
 0xbe7   : > { %2751 = vmatpush3.bf16.msra.mxu0 %v1918_v55 }
 0xbe8   : > { %2768 = vmatprep.subr.bf16.mxu0 %v3128_v18 }
 0xbea   : > { %2753 = vmatmul.mubr.msk.bf16.vlgmr.msra.gmra.mrb[36].mxu0 %vm979_vm3, %v1910_v60 }
 0xbeb   : > { %2772 = vmatprep.mubr.msk.bf16.mxu0 %vm3129_vm2, %v3128_v18  ;;  %2769 = vmatpush3.bf16.msra.mxu0 %v2897_v29 }
 0xbec   : > { %v2938_v56 = vpop.eup %2937  ;;  %2770 = vmatprep.subr.bf16.mxu0 %v3128_v18 }
 0xbed   : > { %v1909_v61 = vmul.f32 %v2938_v56, %v2934_v47  ;;  %v2899_v47 = vld [vmem:[%s3459_s5] sm:$0xff]   ;;  %s3848_s5 = sld [smem:[#allocation18_spill]] }
 0xbef   : > { %v1911_v62 = vpack.c.bf16 %v1909_v61, %v1909_v61  ;;  %2771 = vmatpush3.bf16.msra.mxu0 %v2898_v30 }
 0xbf0   : > { %2776 = vmatprep.subr.bf16.mxu0 %v3128_v18 }
 0xbf1   : > { %2759 = vmatmul.mubr.msk.bf16.vlgmr.msra.gmra.mrb[36].mxu1 %vm979_vm3, %v1911_v62 }
 0xbf2   : > { %2764 = vmatprep.mubr.msk.bf16.mxu1 %vm3129_vm2, %v3128_v18  ;;  %2763 = vmatpush3.bf16.msra.mxu1 %v2014_v0 }
 0xbf3   : > { %p2828_p1 = scmp.eq.s32.totalorder %s3848_s5, 1 }
 0xcbd   : > { %v1954_v1 = vpop.f32.mrb[36].mxu0 }
 0xcbe   : > { %v2754_v4 = vpop.f32.mrb[37].mxu0 }
 0xcbf   : > { %v1957_v5 = vpop.f32.mrb[38].mxu0 }
 0xcc0   : > { %v2755_v6 = vpop.f32.mrb[39].mxu0 }
 0xcc4   : > { %v2002_v7 = vpop.f32.mrb[36].mxu1 }
 0xcc5   : > { %v2008_v8 = vpack.c.bf16 %v2002_v7, %v1954_v1  ;;  %v2760_v59 = vpop.f32.mrb[37].mxu1 }
 0xcc6   : > { %v2005_v9 = vpop.f32.mrb[38].mxu1 }
 0xcc7   : > { %v2761_v10 = vpop.f32.mrb[39].mxu1  ;;  %2765 = vmatmul.mubr.msk.bf16.vlgmr.msra.gmra.mrb[16].mxu1 %vm979_vm3, %v2008_v8  ;;  %v2547_v9 = vld [vmem:[%s729_s22] ss:$0 sm:$0xff]  ;;  %s3035_s22 = scalar_lea.vmem %s2282_s3, 256 }
 0xcc8   : > { %p3036_p6 = scmp.ne.s32.totalorder %s2282_s3, %s3035_s22  ;;  %p3043_p12 = scmp.lt.s32.totalorder %s3035_s22, %s3035_s22 }
 0xcca   : > { %p3037_p4 = pnand %p3036_p6, %p2828_p1  ;;  %p3044_p10 = por %p3043_p12, %p3042_p9 }
 0xccc   : > { %p3038_p7 = pneg %p3037_p4 }
 0xcce   : > { %p3045_p0 = pnand %p3044_p10, %p3038_p7 }
 0xd9a   : > { %v2050_v14 = vpop.f32.mrb[16].mxu1 }
 0xd9b   : > { %v3690_v15 = vadd.f32 %v2050_v14, %v977_v12  ;;  %v2766_v16 = vpop.f32.mrb[17].mxu1 }
 0xd9c   : > { %v2053_v17 = vpop.f32.mrb[18].mxu1 }
 0xd9d   : > { %v3692_v19 = vadd.f32 %v2053_v17, %v978_v13  ;;  %v2767_v20 = vpop.f32.mrb[19].mxu1  ;;  %v2061_v21 = vsel %vm745_vm1, %v3690_v15, 0.0  ;;  %v2111_v10 = vadd.f32 %v3690_v15, %v2547_v9 }
 0xd9e   : > { %2062 = vadd.xlane.f32.xlu1 %v2061_v21 }
 0xd9f   : > { %v2064_v22 = vsel %vm745_vm1, %v3692_v19, 0.0  ;;  %v2112_v14 = vadd.f32 %v3692_v19, %v2547_v9 }
 0xda0   : > { %2065 = vadd.xlane.f32.xlu0 %v2064_v22 }
 0xe2b   : > { %v2063_v2 = vpop.xlane.xlu1 %2062 }
 0xe2c   : > { %v2067_v3 = vmul.f32 0.03125, %v2063_v2 }
 0xe2d   : > { %v2066_v23 = vpop.xlane.xlu0 %2065 }
 0xe2e   : > { %v2069_v24 = vsub.f32 %v3690_v15, %v2067_v3  ;;  %v2068_v25 = vmul.f32 0.03125, %v2066_v23 }
 0xe30   : > { %v2070_v26 = vsub.f32 %v3692_v19, %v2068_v25  ;;  %v2071_v27 = vmul.f32 %v2069_v24, %v2069_v24 }
 0xe32   : > { %v2073_v28 = vsel %vm745_vm1, %v2071_v27, 0.0  ;;  %v2072_v49 = vmul.f32 %v2070_v26, %v2070_v26 }
 0xe33   : > { %2074 = vadd.xlane.f32.xlu0 %v2073_v28 }
 0xe34   : > { %v2076_v52 = vsel %vm745_vm1, %v2072_v49, 0.0 }
 0xe35   : > { %2077 = vadd.xlane.f32.xlu1 %v2076_v52 }
 0xec0   : > { %v2075_v57 = vpop.xlane.xlu0 %2074 }
 0xec1   : > { %v2079_v31 = vmul.f32 0.03125, %v2075_v57 }
 0xec2   : > { %v2078_v32 = vpop.xlane.xlu1 %2077 }
 0xec3   : > { %v2081_v33 = vadd.f32 1e-05, %v2079_v31  ;;  %v2080_v34 = vmul.f32 0.03125, %v2078_v32 }
 0xec5   : > { %2939 = vrsqrt.f32 %v2081_v33  ;;  %v2082_v35 = vadd.f32 1e-05, %v2080_v34 }
 0xec7   : > { %2941 = vrsqrt.f32 %v2082_v35 }
 0xecf   : > { %v2940_v36 = vpop.eup %2939 }
 0xed0   : > { %v2085_v38 = vmul.f32 %v2940_v36, %v2069_v24 }
 0xed1   : > { %v2942_v39 = vpop.eup %2941 }
 0xed2   : > { %v2093_v40 = vmul.f32 %v2545_v37, %v2085_v38  ;;  %v2086_v41 = vmul.f32 %v2942_v39, %v2070_v26 }
 0xed4   : > { %v2094_v43 = vmul.f32 %v2545_v37, %v2086_v41  ;;  %v2101_v44 = vadd.f32 %v2546_v42, %v2093_v40 }
 0xed6   : > { %v2102_v45 = vadd.f32 %v2546_v42, %v2094_v43 }
 0xed8   : > { %v2103_v46 = vpack.c.bf16 %v2102_v45, %v2101_v44 }
 0xeda   : > { %2773 = vmatmul.mubr.msk.bf16.vlgmr.msra.gmra.mrb[40].mxu0 %vm745_vm1, %v2103_v46 }
 0xedb   : > { %2784 = vmatprep.mubr.msk.bf16.mxu0 %vm3129_vm2, %v3128_v18  ;;  %2777 = vmatpush3.bf16.msra.mxu0 %v2899_v47 }
 0xedc   : > { %2778 = vmatprep.subr.bf16.mxu0 %v3128_v18 }
 0xedf   : > { %2779 = vmatpush3.bf16.msra.mxu0 %v2900_v48 }
 0xee0   : > { %2780 = vmatprep.subr.bf16.mxu0 %v3128_v18 }
 0xee3   : > { %2781 = vmatpush3.bf16.msra.mxu0 %v2901_v50 }
 0xee4   : > { %2782 = vmatprep.subr.bf16.mxu0 %v3128_v18 }
 0xee7   : > { %2783 = vmatpush3.bf16.msra.mxu0 %v2902_v58 }
 0xfad   : > { %v2173_v53 = vpop.f32.mrb[40].mxu0 }
 0xfae   : > { %v2174_v54 = vadd.f32 %v2548_v51, %v2173_v53  ;;  %v2774_v55 = vpop.f32.mrb[41].mxu0 }
 0xfaf   : > { %v2176_v60 = vpop.f32.mrb[42].mxu0 }
 0xfb0   : > { %v2182_v56 = vmul.f32 0.70710677, %v2174_v54  ;;  %v2177_v61 = vadd.f32 %v2548_v51, %v2176_v60  ;;  %v2775_v62 = vpop.f32.mrb[43].mxu0  ;;  %v2180_v4 = vmul.f32 0.5, %v2174_v54 }
 0xfb2   : > { %2943 = verf.f32 %v2182_v56  ;;  %v2183_v63 = vmul.f32 0.70710677, %v2177_v61  ;;  %v2181_v5 = vmul.f32 0.5, %v2177_v61 }
 0xfb4   : > { %2945 = verf.f32 %v2183_v63 }
 0xfbc   : > { %v2944_v0 = vpop.eup %2943 }
 0xfbd   : > { %v2186_v18 = vadd.f32 1.0, %v2944_v0 }
 0xfbe   : > { %v2946_v1 = vpop.eup %2945 }
 0xfbf   : > { %v2187_v6 = vadd.f32 1.0, %v2946_v1  ;;  %v2188_v7 = vmul.f32 %v2186_v18, %v2180_v4 }
 0xfc1   : > { %v2189_v8 = vmul.f32 %v2187_v6, %v2181_v5 }
 0xfc3   : > { %v2190_v59 = vpack.c.bf16 %v2189_v8, %v2188_v7 }
 0xfc5   : > { %2785 = vmatmul.mubr.msk.bf16.vlgmr.msra.gmra.mrb[44].mxu0 %vm2223_vm5, %v2190_v59 }
0x1098   : > { %v2261_v11 = vpop.f32.mrb[44].mxu0 }
0x1099   : > { %v2268_v12 = vadd.f32 %v2261_v11, %v2111_v10  ;;  %v2786_v13 = vpop.f32.mrb[45].mxu0 }
0x109a   : > { %v2264_v16 = vpop.f32.mrb[46].mxu0 }
0x109b   : > { %2270 = vst.msk [vmem:[#allocation8] sm:$0xff] %vm745_vm1, %v2268_v12  ;;  %v2269_v17 = vadd.f32 %v2264_v16, %v2112_v14  ;;  %v2787_v20 = vpop.f32.mrb[47].mxu0 }
0x109d   : > { %2271 = vst.msk [vmem:[#allocation8 + $0x8] sm:$0xff] %vm745_vm1, %v2269_v17 }
0x109e   : > { %3048 = shalt.err (!%p3045_p0)
}
0x109f   : > { %s3849_s16 = sld [smem:[#allocation26_spill]] }
0x10a5   : > { %s3850_s28 = smov %s3849_s16  ;;  %s3049_s25 = scalar_lea.hbm %s3849_s16, 256 }
0x10a6   : > { %p3050_p8 = scmp.ne.s32.totalorder %s3850_s28, %s3049_s25  ;;  %p3055_p5 = scmp.lt.u32.totalorder %s3049_s25, %s3850_s28 }
0x10a8   : > { %p3051_p13 = pnand %p3050_p8, %p2828_p1 }
0x10aa   : > { %p3052_p2 = pneg %p3051_p13 }
0x10ac   : > { %p3057_p3 = pnand %p3055_p5, %p3052_p2 }
0x10ae   : > { %3060 = shalt.err (!%p3057_p3)
}
0x10af   : > { %s3134_s6 = smov 128   ;;  %s3135_s15 = smov 8  }
0x10b0   : > { %2811 = dma.vmem_to_hbm [thread:$0]  (%p2828_p1), %s2282_s3, 256, %s3850_s28, [#allocation4], %s3134_s6, %s3134_s6, %s3135_s15  }
0x10b1   : > { %3094 = dma.done.wait (%p2828_p1), [#allocation4], 256  }
0x10b2   : > { %3096 = vsyncadd (%p2828_p1), [#allocation4], 4294967040 }
0x10b3 PF: > { %s3851_s0 = sld [smem:[#allocation15_spill]]  ;;  %s3852_s29 = sld [smem:[#allocation12_spill]] }
0x10b4   : > { %s3853_s30 = sld [smem:[#allocation13_spill]]  ;;  %s3854_s15 = sld [smem:[#allocation17_spill]] }
0x10b5   : > { %s3855_s16 = sld [smem:[#allocation14_spill]]  ;;  %s3856_s17 = sld [smem:[#allocation16_spill]] }
0x10b9   : > { %s29_s18 = sadd.s32 1, %s3851_s0  }
0x10ba   : > { %p26_p11 = scmp.ge.s32.totalorder %s29_s18, 4  }
0x10bc   :  { %28 = sbr.rel (!%p26_p11) target bundleno = 15 (0xf), region = 168 }
0x10c3   :  { %2297 = vsyncpa [#allocation3], 1 }
0x10c4   :  { %2299 = vsyncpa [#allocation3 + $0x1], 1 }
0x10c5   :  { %2300 = vsyncpa [#allocation6], 1 }
0x10c6   :  { %2302 = vsyncpa [#allocation6 + $0x1], 1 }
0x10c7   :  { %2303 = vsyncpa [#allocation4], 1 }
0x10c8   :  { %2305 = vsyncpa [#allocation4 + $0x1], 1 }

</bundles_post_ra>
